<compile_context>
chip_gen: v5e
topology: v5e:2x2
jax: 0.10.0
libtpu: 0.0.40
codegen_flags: <defaults>
</compile_context>

<pallas_src>
import functools

import jax
import jax.numpy as jnp
from jax.experimental import pallas as pl
from jax.experimental.pallas import tpu as pltpu

EPS = 1e-5


def _residual_block_kernel(x_ref, mask_ref, p_ref, o_ref, stack_ref,
                           *, offsets, inv_n, sec):
    CB, Lp = x_ref.shape
    K = 9 * CB

    mask = mask_ref[...]                            # (1, Lp): 1.0 at interior pixels
    w1 = p_ref[:, 0:K]                              # (CB, 9*CB) expanded conv1 weight
    w2 = p_ref[:, sec:sec + K]                      # (CB, 9*CB) expanded conv2 weight
    agg = p_ref[:, 2 * sec:2 * sec + CB]            # (CB, CB) 0/1 per-channel batch-sum matrix
    g1 = p_ref[:, 3 * sec + 0:3 * sec + 1]          # (CB, 1) BN params (replicated per batch row)
    be1 = p_ref[:, 3 * sec + 1:3 * sec + 2]
    g2 = p_ref[:, 3 * sec + 2:3 * sec + 3]
    be2 = p_ref[:, 3 * sec + 3:3 * sec + 4]

    def conv3x3(inp, w_exp):
        # im2col by 9 static lane rotations (XLU) into the VMEM scratch, then a
        # single MXU matmul does all (tap, cin, batch) -> (cout, batch) mixing.
        # Each row is one image's zero-padded channel plane, so a roll never
        # mixes data across images; interior outputs are exact, halo/tail
        # outputs are garbage and get masked or sliced away.
        for t, off in enumerate(offsets):
            shifted = inp if off == 0 else pltpu.roll(inp, shift=(-off) % Lp, axis=1)
            stack_ref[t * CB:(t + 1) * CB, :] = shifted
        return jnp.dot(w_exp, stack_ref[...],
                       preferred_element_type=jnp.float32,
                       precision=jax.lax.Precision.HIGHEST)

    def batchnorm(y, gamma, beta):
        # Training-mode BN over the B*H*W interior pixels, centered two-pass.
        # agg sums the B batch rows of each channel and broadcasts the result
        # back to every row in one tiny MXU matmul.
        ym = y * mask
        mean = jnp.sum(jnp.dot(agg, ym, preferred_element_type=jnp.float32,
                               precision=jax.lax.Precision.HIGHEST),
                       axis=1, keepdims=True) * inv_n               # (CB, 1)
        d = ym - mean * mask                                        # (y - mean) on interior, 0 elsewhere
        var = jnp.sum(jnp.dot(agg, d * d, preferred_element_type=jnp.float32,
                              precision=jax.lax.Precision.HIGHEST),
                      axis=1, keepdims=True) * inv_n                # biased variance, >= 0
        scale = gamma * jax.lax.rsqrt(var + EPS)
        return y * scale + (beta - mean * scale)

    # conv1 -> bn1 -> relu   (conv bias omitted: exactly absorbed by train-mode BN)
    h = conv3x3(x_ref[...], w1)
    h = jnp.maximum(batchnorm(h, g1, be1), 0.0)
    h = h * mask            # re-zero halo/tail so conv2 sees proper "same" zero padding

    # conv2 -> bn2 -> +residual -> relu   (residual re-read from x_ref, not held live)
    y = batchnorm(conv3x3(h, w2), g2, be2)
    o_ref[...] = jnp.maximum(y + x_ref[...], 0.0)


def simple_residual_block(x_nchw, params):
    """x_nchw: (B, C, H, W) float32. params = (w1, b1, g1, be1, w2, b2, g2, be2)
    in PyTorch convention. Conv biases are accepted but unused: training-mode
    BatchNorm cancels them exactly, so dropping them is bit-equivalent on the
    interior output."""
    w1, _b1, g1, be1, w2, _b2, g2, be2 = params
    B, C, H, W = x_nchw.shape
    Hp, Wp = H + 2, W + 2
    P = Hp * Wp
    Lp = ((P + 127) // 128) * 128            # lane-align the flattened plane
    CB = C * B
    K = 9 * CB
    SEC = ((max(K, CB) + 127) // 128) * 128  # 128-lane-aligned sections in the packed params
    inv_n = 1.0 / (B * H * W)

    # (B, C, H, W) -> per-(channel, batch) zero-padded planes: (C*B, Lp), row = c*B + b.
    xp = jnp.pad(jnp.transpose(x_nchw.astype(jnp.float32), (1, 0, 2, 3)),
                 ((0, 0), (0, 0), (1, 1), (1, 1)))                 # (C, B, Hp, Wp)
    xflat = jnp.pad(xp.reshape(CB, P), ((0, 0), (0, Lp - P)))

    # Interior-pixel mask, identical for every row: (1, Lp).
    mask = jnp.pad(jnp.ones((H, W), jnp.float32), ((1, 1), (1, 1))).reshape(1, P)
    mask = jnp.pad(mask, ((0, 0), (0, Lp - P)))

    def expand_w(w):
        # OIHW -> batch-block-diagonal (C*B, 9*C*B):
        #   W_exp[o*B + b, t*C*B + c*B + b'] = w[o, c, ky, kx] * (b == b'), t = ky*3 + kx
        wt = jnp.transpose(w.astype(jnp.float32), (2, 3, 0, 1)).reshape(9, C, C)
        eye = jnp.eye(B, dtype=jnp.float32)
        return jnp.einsum('toc,bd->obtcd', wt, eye).reshape(CB, K)

    # 0/1 matrix summing over the B batch rows of each channel (rows are c*B + b).
    ch = jnp.arange(CB) // B
    agg = (ch[:, None] == ch[None, :]).astype(jnp.float32)

    # Pack everything the kernel needs into ONE (CB, 3*SEC + 4) array.
    pk = jnp.zeros((CB, 3 * SEC + 4), jnp.float32)
    pk = pk.at[:, 0:K].set(expand_w(w1))
    pk = pk.at[:, SEC:SEC + K].set(expand_w(w2))
    pk = pk.at[:, 2 * SEC:2 * SEC + CB].set(agg)
    pk = pk.at[:, 3 * SEC + 0].set(jnp.repeat(g1.astype(jnp.float32), B))
    pk = pk.at[:, 3 * SEC + 1].set(jnp.repeat(be1.astype(jnp.float32), B))
    pk = pk.at[:, 3 * SEC + 2].set(jnp.repeat(g2.astype(jnp.float32), B))
    pk = pk.at[:, 3 * SEC + 3].set(jnp.repeat(be2.astype(jnp.float32), B))

    # Flattened-plane offset of each of the 9 taps (dy, dx in {-1, 0, 1}).
    offsets = tuple((dy - 1) * Wp + (dx - 1) for dy in range(3) for dx in range(3))

    kernel = functools.partial(_residual_block_kernel,
                               offsets=offsets, inv_n=inv_n, sec=SEC)

    vmem = pl.BlockSpec(memory_space=pltpu.MemorySpace.VMEM)
    out_flat = pl.pallas_call(
        kernel,
        out_shape=jax.ShapeDtypeStruct((CB, Lp), jnp.float32),
        in_specs=[vmem, vmem, vmem],
        out_specs=vmem,
        scratch_shapes=[pltpu.VMEM((9 * CB, Lp), jnp.float32)],   # im2col stack, reused by both convs
    )(xflat, mask, pk)

    # Kernel output is lane-dense (CB, Lp); layout plumbing back to NCHW here.
    out = out_flat[:, :P].reshape(C, B, Hp, Wp)[:, :, 1:Hp - 1, 1:Wp - 1]
    return jnp.transpose(out, (1, 0, 2, 3))


def _reference_forward(x_nchw, params):
    """Pure-JAX reference of the PyTorch forward (training-mode BN, with biases)."""
    w1, b1, g1, be1, w2, b2, g2, be2 = params

    def conv(x, w, b):
        y = jax.lax.conv_general_dilated(
            x, w, window_strides=(1, 1), padding="SAME",
            dimension_numbers=("NCHW", "OIHW", "NCHW"))
        return y + b[None, :, None, None]

    def bn(x, g, be):
        m = jnp.mean(x, axis=(0, 2, 3), keepdims=True)
        v = jnp.mean((x - m) ** 2, axis=(0, 2, 3), keepdims=True)
        return ((x - m) * jax.lax.rsqrt(v + EPS) * g[None, :, None, None]
                + be[None, :, None, None])

    out = jnp.maximum(bn(conv(x_nchw, w1, b1), g1, be1), 0.0)
    out = bn(conv(out, w2, b2), g2, be2) + x_nchw
    return jnp.maximum(out, 0.0)


if __name__ == "__main__":
    B, C, H, W = 2, 4, 16, 16
    key = jax.random.PRNGKey(0)
    k_x, k_w1, k_b1, k_w2, k_b2 = jax.random.split(key, 5)

    x = jax.random.normal(k_x, (B, C, H, W), jnp.float32)

    # Deterministic init mimicking PyTorch Conv2d defaults (uniform +/- 1/sqrt(fan_in)).
    fan_in = C * 3 * 3
    bound = 1.0 / jnp.sqrt(jnp.float32(fan_in))
    w1 = jax.random.uniform(k_w1, (C, C, 3, 3), jnp.float32, -bound, bound)  # OIHW
    b1 = jax.random.uniform(k_b1, (C,), jnp.float32, -bound, bound)
    w2 = jax.random.uniform(k_w2, (C, C, 3, 3), jnp.float32, -bound, bound)
    b2 = jax.random.uniform(k_b2, (C,), jnp.float32, -bound, bound)
    g1 = jnp.ones((C,), jnp.float32)    # BatchNorm weight init
    be1 = jnp.zeros((C,), jnp.float32)  # BatchNorm bias init
    g2 = jnp.ones((C,), jnp.float32)
    be2 = jnp.zeros((C,), jnp.float32)

    params = (w1, b1, g1, be1, w2, b2, g2, be2)

    out = jax.block_until_ready(simple_residual_block(x, params))
    ref = jax.block_until_ready(_reference_forward(x, params))

    assert out.shape == (B, C, H, W)
    assert jnp.allclose(out, ref, atol=2e-3, rtol=2e-3), "mismatch vs reference"
    print("KERNEL_OK")
</pallas_src>

<mosaic_0001>
module attributes {stable_mosaic.version = 11 : i64} {
  func.func @_residual_block_kernel(%arg0: memref<8x384xf32, #tpu.memory_space<vmem>>, %arg1: memref<1x384xf32, #tpu.memory_space<vmem>>, %arg2: memref<8x388xf32, #tpu.memory_space<vmem>>, %arg3: memref<8x384xf32, #tpu.memory_space<vmem>>, %arg4: memref<72x384xf32, #tpu.memory_space<vmem>>) attributes {dimension_semantics = [], scalar_prefetch = 0 : i64, scratch_operands = 1 : i64, tpu.core_type = #tpu.core_type<tc>} {
    %c0 = arith.constant 0 : index
    %c0_0 = arith.constant 0 : index
    %0 = vector.load %arg1[%c0, %c0_0] : memref<1x384xf32, #tpu.memory_space<vmem>>, vector<1x384xf32>
    %c0_1 = arith.constant 0 : index
    %c0_2 = arith.constant 0 : index
    %1 = vector.load %arg2[%c0_1, %c0_2] : memref<8x388xf32, #tpu.memory_space<vmem>>, vector<8x72xf32>
    %c0_3 = arith.constant 0 : index
    %c128 = arith.constant 128 : index
    %2 = vector.load %arg2[%c0_3, %c128] : memref<8x388xf32, #tpu.memory_space<vmem>>, vector<8x72xf32>
    %c0_4 = arith.constant 0 : index
    %c256 = arith.constant 256 : index
    %3 = vector.load %arg2[%c0_4, %c256] : memref<8x388xf32, #tpu.memory_space<vmem>>, vector<8x8xf32>
    %c0_5 = arith.constant 0 : index
    %c384 = arith.constant 384 : index
    %4 = vector.load %arg2[%c0_5, %c384] : memref<8x388xf32, #tpu.memory_space<vmem>>, vector<8x1xf32>
    %c0_6 = arith.constant 0 : index
    %c385 = arith.constant 385 : index
    %5 = vector.load %arg2[%c0_6, %c385] : memref<8x388xf32, #tpu.memory_space<vmem>>, vector<8x1xf32>
    %c0_7 = arith.constant 0 : index
    %c386 = arith.constant 386 : index
    %6 = vector.load %arg2[%c0_7, %c386] : memref<8x388xf32, #tpu.memory_space<vmem>>, vector<8x1xf32>
    %c0_8 = arith.constant 0 : index
    %c387 = arith.constant 387 : index
    %7 = vector.load %arg2[%c0_8, %c387] : memref<8x388xf32, #tpu.memory_space<vmem>>, vector<8x1xf32>
    %c0_9 = arith.constant 0 : index
    %c0_10 = arith.constant 0 : index
    %8 = vector.load %arg0[%c0_9, %c0_10] : memref<8x384xf32, #tpu.memory_space<vmem>>, vector<8x384xf32>
    %c19_i32 = arith.constant 19 : i32
    %9 = tpu.dynamic_rotate %8 by %c19_i32 dim 1 : vector<8x384xf32>, i32 -> vector<8x384xf32>
    %c0_11 = arith.constant 0 : index
    %c0_12 = arith.constant 0 : index
    %10 = vector.load %arg4[%c0_11, %c0_12] : memref<72x384xf32, #tpu.memory_space<vmem>>, vector<8x384xf32>
    tpu.vector_store %arg4[%c0_11, %c0_12], %9 {strides = array<i32>} : memref<72x384xf32, #tpu.memory_space<vmem>>, vector<8x384xf32>,
    %c18_i32 = arith.constant 18 : i32
    %11 = tpu.dynamic_rotate %8 by %c18_i32 dim 1 : vector<8x384xf32>, i32 -> vector<8x384xf32>
    %c8 = arith.constant 8 : index
    %c0_13 = arith.constant 0 : index
    %12 = vector.load %arg4[%c8, %c0_13] : memref<72x384xf32, #tpu.memory_space<vmem>>, vector<8x384xf32>
    tpu.vector_store %arg4[%c8, %c0_13], %11 {strides = array<i32>} : memref<72x384xf32, #tpu.memory_space<vmem>>, vector<8x384xf32>,
    %c17_i32 = arith.constant 17 : i32
    %13 = tpu.dynamic_rotate %8 by %c17_i32 dim 1 : vector<8x384xf32>, i32 -> vector<8x384xf32>
    %c16 = arith.constant 16 : index
    %c0_14 = arith.constant 0 : index
    %14 = vector.load %arg4[%c16, %c0_14] : memref<72x384xf32, #tpu.memory_space<vmem>>, vector<8x384xf32>
    tpu.vector_store %arg4[%c16, %c0_14], %13 {strides = array<i32>} : memref<72x384xf32, #tpu.memory_space<vmem>>, vector<8x384xf32>,
    %c1_i32 = arith.constant 1 : i32
    %15 = tpu.dynamic_rotate %8 by %c1_i32 dim 1 : vector<8x384xf32>, i32 -> vector<8x384xf32>
    %c24 = arith.constant 24 : index
    %c0_15 = arith.constant 0 : index
    %16 = vector.load %arg4[%c24, %c0_15] : memref<72x384xf32, #tpu.memory_space<vmem>>, vector<8x384xf32>
    tpu.vector_store %arg4[%c24, %c0_15], %15 {strides = array<i32>} : memref<72x384xf32, #tpu.memory_space<vmem>>, vector<8x384xf32>,
    %c32 = arith.constant 32 : index
    %c0_16 = arith.constant 0 : index
    %17 = vector.load %arg4[%c32, %c0_16] : memref<72x384xf32, #tpu.memory_space<vmem>>, vector<8x384xf32>
    tpu.vector_store %arg4[%c32, %c0_16], %8 {strides = array<i32>} : memref<72x384xf32, #tpu.memory_space<vmem>>, vector<8x384xf32>,
    %c383_i32 = arith.constant 383 : i32
    %18 = tpu.dynamic_rotate %8 by %c383_i32 dim 1 : vector<8x384xf32>, i32 -> vector<8x384xf32>
    %c40 = arith.constant 40 : index
    %c0_17 = arith.constant 0 : index
    %19 = vector.load %arg4[%c40, %c0_17] : memref<72x384xf32, #tpu.memory_space<vmem>>, vector<8x384xf32>
    tpu.vector_store %arg4[%c40, %c0_17], %18 {strides = array<i32>} : memref<72x384xf32, #tpu.memory_space<vmem>>, vector<8x384xf32>,
    %c367_i32 = arith.constant 367 : i32
    %20 = tpu.dynamic_rotate %8 by %c367_i32 dim 1 : vector<8x384xf32>, i32 -> vector<8x384xf32>
    %c48 = arith.constant 48 : index
    %c0_18 = arith.constant 0 : index
    %21 = vector.load %arg4[%c48, %c0_18] : memref<72x384xf32, #tpu.memory_space<vmem>>, vector<8x384xf32>
    tpu.vector_store %arg4[%c48, %c0_18], %20 {strides = array<i32>} : memref<72x384xf32, #tpu.memory_space<vmem>>, vector<8x384xf32>,
    %c366_i32 = arith.constant 366 : i32
    %22 = tpu.dynamic_rotate %8 by %c366_i32 dim 1 : vector<8x384xf32>, i32 -> vector<8x384xf32>
    %c56 = arith.constant 56 : index
    %c0_19 = arith.constant 0 : index
    %23 = vector.load %arg4[%c56, %c0_19] : memref<72x384xf32, #tpu.memory_space<vmem>>, vector<8x384xf32>
    tpu.vector_store %arg4[%c56, %c0_19], %22 {strides = array<i32>} : memref<72x384xf32, #tpu.memory_space<vmem>>, vector<8x384xf32>,
    %c365_i32 = arith.constant 365 : i32
    %24 = tpu.dynamic_rotate %8 by %c365_i32 dim 1 : vector<8x384xf32>, i32 -> vector<8x384xf32>
    %c64 = arith.constant 64 : index
    %c0_20 = arith.constant 0 : index
    %25 = vector.load %arg4[%c64, %c0_20] : memref<72x384xf32, #tpu.memory_space<vmem>>, vector<8x384xf32>
    tpu.vector_store %arg4[%c64, %c0_20], %24 {strides = array<i32>} : memref<72x384xf32, #tpu.memory_space<vmem>>, vector<8x384xf32>,
    %c0_21 = arith.constant 0 : index
    %c0_22 = arith.constant 0 : index
    %26 = vector.load %arg4[%c0_21, %c0_22] : memref<72x384xf32, #tpu.memory_space<vmem>>, vector<72x384xf32>
    %cst = arith.constant dense<0.000000e+00> : vector<8x384xf32>
    %27 = tpu.matmul %1, %26, %cst {dimension_numbers = #tpu.dot_dimension_numbers<[1], [0], [0], [1], [0, 0, 1, 1], [], []>, precision = #tpu.contract_precision<fp32>} : vector<8x72xf32>, vector<72x384xf32>, vector<8x384xf32> -> vector<8x384xf32>
    %28 = vector.broadcast %0 : vector<1x384xf32> to vector<8x384xf32>
    %29 = arith.mulf %27, %28 : vector<8x384xf32>
    %cst_23 = arith.constant dense<0.000000e+00> : vector<8x384xf32>
    %30 = tpu.matmul %3, %29, %cst_23 {dimension_numbers = #tpu.dot_dimension_numbers<[1], [0], [0], [1], [0, 0, 1, 1], [], []>, precision = #tpu.contract_precision<fp32>} : vector<8x8xf32>, vector<8x384xf32>, vector<8x384xf32> -> vector<8x384xf32>
    %cst_24 = arith.constant dense<0.000000e+00> : vector<8xf32>
    %31 = vector.multi_reduction <add>, %30, %cst_24 [1] : vector<8x384xf32> to vector<8xf32>
    %32 = vector.shape_cast %31 : vector<8xf32> to vector<8x1xf32>
    %cst_25 = arith.constant 0.001953125 : f32
    %33 = vector.broadcast %cst_25 : f32 to vector<8x1xf32>
    %34 = arith.mulf %32, %33 : vector<8x1xf32>
    %35 = vector.broadcast %34 : vector<8x1xf32> to vector<8x384xf32>
    %36 = vector.broadcast %0 : vector<1x384xf32> to vector<8x384xf32>
    %37 = arith.mulf %35, %36 : vector<8x384xf32>
    %38 = arith.subf %29, %37 : vector<8x384xf32>
    %39 = arith.mulf %38, %38 : vector<8x384xf32>
    %cst_26 = arith.constant dense<0.000000e+00> : vector<8x384xf32>
    %40 = tpu.matmul %3, %39, %cst_26 {dimension_numbers = #tpu.dot_dimension_numbers<[1], [0], [0], [1], [0, 0, 1, 1], [], []>, precision = #tpu.contract_precision<fp32>} : vector<8x8xf32>, vector<8x384xf32>, vector<8x384xf32> -> vector<8x384xf32>
    %cst_27 = arith.constant dense<0.000000e+00> : vector<8xf32>
    %41 = vector.multi_reduction <add>, %40, %cst_27 [1] : vector<8x384xf32> to vector<8xf32>
    %42 = vector.shape_cast %41 : vector<8xf32> to vector<8x1xf32>
    %cst_28 = arith.constant 0.001953125 : f32
    %43 = vector.broadcast %cst_28 : f32 to vector<8x1xf32>
    %44 = arith.mulf %42, %43 : vector<8x1xf32>
    %cst_29 = arith.constant 9.99999974E-6 : f32
    %45 = vector.broadcast %cst_29 : f32 to vector<8x1xf32>
    %46 = arith.addf %44, %45 : vector<8x1xf32>
    %47 = math.rsqrt %46 : vector<8x1xf32>
    %48 = arith.mulf %4, %47 : vector<8x1xf32>
    %49 = vector.broadcast %48 : vector<8x1xf32> to vector<8x384xf32>
    %50 = arith.mulf %27, %49 : vector<8x384xf32>
    %51 = arith.mulf %34, %48 : vector<8x1xf32>
    %52 = arith.subf %5, %51 : vector<8x1xf32>
    %53 = vector.broadcast %52 : vector<8x1xf32> to vector<8x384xf32>
    %54 = arith.addf %50, %53 : vector<8x384xf32>
    %cst_30 = arith.constant 0.000000e+00 : f32
    %55 = vector.broadcast %cst_30 : f32 to vector<8x384xf32>
    %56 = arith.maximumf %54, %55 : vector<8x384xf32>
    %57 = vector.broadcast %0 : vector<1x384xf32> to vector<8x384xf32>
    %58 = arith.mulf %56, %57 : vector<8x384xf32>
    %c19_i32_31 = arith.constant 19 : i32
    %59 = tpu.dynamic_rotate %58 by %c19_i32_31 dim 1 : vector<8x384xf32>, i32 -> vector<8x384xf32>
    %c0_32 = arith.constant 0 : index
    %c0_33 = arith.constant 0 : index
    %60 = vector.load %arg4[%c0_32, %c0_33] : memref<72x384xf32, #tpu.memory_space<vmem>>, vector<8x384xf32>
    tpu.vector_store %arg4[%c0_32, %c0_33], %59 {strides = array<i32>} : memref<72x384xf32, #tpu.memory_space<vmem>>, vector<8x384xf32>,
    %c18_i32_34 = arith.constant 18 : i32
    %61 = tpu.dynamic_rotate %58 by %c18_i32_34 dim 1 : vector<8x384xf32>, i32 -> vector<8x384xf32>
    %c8_35 = arith.constant 8 : index
    %c0_36 = arith.constant 0 : index
    %62 = vector.load %arg4[%c8_35, %c0_36] : memref<72x384xf32, #tpu.memory_space<vmem>>, vector<8x384xf32>
    tpu.vector_store %arg4[%c8_35, %c0_36], %61 {strides = array<i32>} : memref<72x384xf32, #tpu.memory_space<vmem>>, vector<8x384xf32>,
    %c17_i32_37 = arith.constant 17 : i32
    %63 = tpu.dynamic_rotate %58 by %c17_i32_37 dim 1 : vector<8x384xf32>, i32 -> vector<8x384xf32>
    %c16_38 = arith.constant 16 : index
    %c0_39 = arith.constant 0 : index
    %64 = vector.load %arg4[%c16_38, %c0_39] : memref<72x384xf32, #tpu.memory_space<vmem>>, vector<8x384xf32>
    tpu.vector_store %arg4[%c16_38, %c0_39], %63 {strides = array<i32>} : memref<72x384xf32, #tpu.memory_space<vmem>>, vector<8x384xf32>,
    %c1_i32_40 = arith.constant 1 : i32
    %65 = tpu.dynamic_rotate %58 by %c1_i32_40 dim 1 : vector<8x384xf32>, i32 -> vector<8x384xf32>
    %c24_41 = arith.constant 24 : index
    %c0_42 = arith.constant 0 : index
    %66 = vector.load %arg4[%c24_41, %c0_42] : memref<72x384xf32, #tpu.memory_space<vmem>>, vector<8x384xf32>
    tpu.vector_store %arg4[%c24_41, %c0_42], %65 {strides = array<i32>} : memref<72x384xf32, #tpu.memory_space<vmem>>, vector<8x384xf32>,
    %c32_43 = arith.constant 32 : index
    %c0_44 = arith.constant 0 : index
    %67 = vector.load %arg4[%c32_43, %c0_44] : memref<72x384xf32, #tpu.memory_space<vmem>>, vector<8x384xf32>
    tpu.vector_store %arg4[%c32_43, %c0_44], %58 {strides = array<i32>} : memref<72x384xf32, #tpu.memory_space<vmem>>, vector<8x384xf32>,
    %c383_i32_45 = arith.constant 383 : i32
    %68 = tpu.dynamic_rotate %58 by %c383_i32_45 dim 1 : vector<8x384xf32>, i32 -> vector<8x384xf32>
    %c40_46 = arith.constant 40 : index
    %c0_47 = arith.constant 0 : index
    %69 = vector.load %arg4[%c40_46, %c0_47] : memref<72x384xf32, #tpu.memory_space<vmem>>, vector<8x384xf32>
    tpu.vector_store %arg4[%c40_46, %c0_47], %68 {strides = array<i32>} : memref<72x384xf32, #tpu.memory_space<vmem>>, vector<8x384xf32>,
    %c367_i32_48 = arith.constant 367 : i32
    %70 = tpu.dynamic_rotate %58 by %c367_i32_48 dim 1 : vector<8x384xf32>, i32 -> vector<8x384xf32>
    %c48_49 = arith.constant 48 : index
    %c0_50 = arith.constant 0 : index
    %71 = vector.load %arg4[%c48_49, %c0_50] : memref<72x384xf32, #tpu.memory_space<vmem>>, vector<8x384xf32>
    tpu.vector_store %arg4[%c48_49, %c0_50], %70 {strides = array<i32>} : memref<72x384xf32, #tpu.memory_space<vmem>>, vector<8x384xf32>,
    %c366_i32_51 = arith.constant 366 : i32
    %72 = tpu.dynamic_rotate %58 by %c366_i32_51 dim 1 : vector<8x384xf32>, i32 -> vector<8x384xf32>
    %c56_52 = arith.constant 56 : index
    %c0_53 = arith.constant 0 : index
    %73 = vector.load %arg4[%c56_52, %c0_53] : memref<72x384xf32, #tpu.memory_space<vmem>>, vector<8x384xf32>
    tpu.vector_store %arg4[%c56_52, %c0_53], %72 {strides = array<i32>} : memref<72x384xf32, #tpu.memory_space<vmem>>, vector<8x384xf32>,
    %c365_i32_54 = arith.constant 365 : i32
    %74 = tpu.dynamic_rotate %58 by %c365_i32_54 dim 1 : vector<8x384xf32>, i32 -> vector<8x384xf32>
    %c64_55 = arith.constant 64 : index
    %c0_56 = arith.constant 0 : index
    %75 = vector.load %arg4[%c64_55, %c0_56] : memref<72x384xf32, #tpu.memory_space<vmem>>, vector<8x384xf32>
    tpu.vector_store %arg4[%c64_55, %c0_56], %74 {strides = array<i32>} : memref<72x384xf32, #tpu.memory_space<vmem>>, vector<8x384xf32>,
    %c0_57 = arith.constant 0 : index
    %c0_58 = arith.constant 0 : index
    %76 = vector.load %arg4[%c0_57, %c0_58] : memref<72x384xf32, #tpu.memory_space<vmem>>, vector<72x384xf32>
    %cst_59 = arith.constant dense<0.000000e+00> : vector<8x384xf32>
    %77 = tpu.matmul %2, %76, %cst_59 {dimension_numbers = #tpu.dot_dimension_numbers<[1], [0], [0], [1], [0, 0, 1, 1], [], []>, precision = #tpu.contract_precision<fp32>} : vector<8x72xf32>, vector<72x384xf32>, vector<8x384xf32> -> vector<8x384xf32>
    %78 = vector.broadcast %0 : vector<1x384xf32> to vector<8x384xf32>
    %79 = arith.mulf %77, %78 : vector<8x384xf32>
    %cst_60 = arith.constant dense<0.000000e+00> : vector<8x384xf32>
    %80 = tpu.matmul %3, %79, %cst_60 {dimension_numbers = #tpu.dot_dimension_numbers<[1], [0], [0], [1], [0, 0, 1, 1], [], []>, precision = #tpu.contract_precision<fp32>} : vector<8x8xf32>, vector<8x384xf32>, vector<8x384xf32> -> vector<8x384xf32>
    %cst_61 = arith.constant dense<0.000000e+00> : vector<8xf32>
    %81 = vector.multi_reduction <add>, %80, %cst_61 [1] : vector<8x384xf32> to vector<8xf32>
    %82 = vector.shape_cast %81 : vector<8xf32> to vector<8x1xf32>
    %cst_62 = arith.constant 0.001953125 : f32
    %83 = vector.broadcast %cst_62 : f32 to vector<8x1xf32>
    %84 = arith.mulf %82, %83 : vector<8x1xf32>
    %85 = vector.broadcast %84 : vector<8x1xf32> to vector<8x384xf32>
    %86 = vector.broadcast %0 : vector<1x384xf32> to vector<8x384xf32>
    %87 = arith.mulf %85, %86 : vector<8x384xf32>
    %88 = arith.subf %79, %87 : vector<8x384xf32>
    %89 = arith.mulf %88, %88 : vector<8x384xf32>
    %cst_63 = arith.constant dense<0.000000e+00> : vector<8x384xf32>
    %90 = tpu.matmul %3, %89, %cst_63 {dimension_numbers = #tpu.dot_dimension_numbers<[1], [0], [0], [1], [0, 0, 1, 1], [], []>, precision = #tpu.contract_precision<fp32>} : vector<8x8xf32>, vector<8x384xf32>, vector<8x384xf32> -> vector<8x384xf32>
    %cst_64 = arith.constant dense<0.000000e+00> : vector<8xf32>
    %91 = vector.multi_reduction <add>, %90, %cst_64 [1] : vector<8x384xf32> to vector<8xf32>
    %92 = vector.shape_cast %91 : vector<8xf32> to vector<8x1xf32>
    %cst_65 = arith.constant 0.001953125 : f32
    %93 = vector.broadcast %cst_65 : f32 to vector<8x1xf32>
    %94 = arith.mulf %92, %93 : vector<8x1xf32>
    %cst_66 = arith.constant 9.99999974E-6 : f32
    %95 = vector.broadcast %cst_66 : f32 to vector<8x1xf32>
    %96 = arith.addf %94, %95 : vector<8x1xf32>
    %97 = math.rsqrt %96 : vector<8x1xf32>
    %98 = arith.mulf %6, %97 : vector<8x1xf32>
    %99 = vector.broadcast %98 : vector<8x1xf32> to vector<8x384xf32>
    %100 = arith.mulf %77, %99 : vector<8x384xf32>
    %101 = arith.mulf %84, %98 : vector<8x1xf32>
    %102 = arith.subf %7, %101 : vector<8x1xf32>
    %103 = vector.broadcast %102 : vector<8x1xf32> to vector<8x384xf32>
    %104 = arith.addf %100, %103 : vector<8x384xf32>
    %c0_67 = arith.constant 0 : index
    %c0_68 = arith.constant 0 : index
    %105 = vector.load %arg0[%c0_67, %c0_68] : memref<8x384xf32, #tpu.memory_space<vmem>>, vector<8x384xf32>
    %106 = arith.addf %104, %105 : vector<8x384xf32>
    %cst_69 = arith.constant 0.000000e+00 : f32
    %107 = vector.broadcast %cst_69 : f32 to vector<8x384xf32>
    %108 = arith.maximumf %106, %107 : vector<8x384xf32>
    %c0_70 = arith.constant 0 : index
    %c0_71 = arith.constant 0 : index
    %109 = vector.load %arg3[%c0_70, %c0_71] : memref<8x384xf32, #tpu.memory_space<vmem>>, vector<8x384xf32>
    tpu.vector_store %arg3[%c0_70, %c0_71], %108 {strides = array<i32>} : memref<8x384xf32, #tpu.memory_space<vmem>>, vector<8x384xf32>,
    return
  }
}

</mosaic_0001>

<bundles_post_ra>
// kernel: tpu_custom_call.1
= control target key start
LH: loop header
LB: loop body
LE: loop exit
PB: predicated region body
PF: predicated region fallthrough
CT: control target
= control target key end

     0   :  { %8 = vsyncpa [#allocation4], 0  ;;  %s5290_s0 = inlined_call_operand.hbm [shape: f32[8,384], index: 0, kind: input, shape index: {}]   ;;  %s5291_s1 = inlined_call_operand.hbm [shape: f32[1,384], index: 1, kind: input, shape index: {}]   ;;  %s5292_s2 = inlined_call_operand.hbm [shape: f32[8,388], index: 2, kind: input, shape index: {}]   ;;  %s5293_s3 = inlined_call_operand.hbm [shape: f32[8,384], index: 3, kind: output, shape index: {}]  }
   0x1   :  { %9 = vsyncpa [#allocation7], 0  ;;  %s27_s14 = sshll.u32 %s5291_s1, 4  ;;  %s28_s14 = int_to_ptr.hbm [resolvable:$true] %s27_s14 }
   0x2   :  { %10 = vsyncpa [#allocation5], 0  ;;  %s3872_s15 = smov [#allocation6]   ;;  %s16_s19 = sshll.u32 %s5290_s0, 4  ;;  %s17_s19 = int_to_ptr.hbm [resolvable:$true] %s16_s19 }
   0x3   :  { %s29_s16 = sshll.u32 %s3872_s15, 4  ;;  %s3873_s20 = smov [#allocation3]   ;;  %s30_s16 = int_to_ptr.vmem [resolvable:$true] %s29_s16 }
   0x4   :  { %32 = dma.hbm_to_vmem [thread:$0]  %s28_s14, 48, %s30_s16, [#allocation7]  }
   0x5   :  { %s18_s21 = sshll.u32 %s3873_s20, 4  ;;  %s38_s24 = sshll.u32 %s5292_s2, 4  ;;  %s19_s21 = int_to_ptr.vmem [resolvable:$true] %s18_s21  ;;  %s39_s24 = int_to_ptr.hbm [resolvable:$true] %s38_s24 }
   0x6   :  { %21 = dma.hbm_to_vmem [thread:$0]  %s17_s19, 384, %s19_s21, [#allocation4]  }
   0x7   :  { %s3874_s1 = smov [#allocation8]  }
   0x8   :  { %s40_s25 = sshll.u32 %s3874_s1, 4  ;;  %s41_s25 = int_to_ptr.vmem [resolvable:$true] %s40_s25 }
   0x9   :  { %43 = dma.hbm_to_vmem [thread:$0]  %s39_s24, 512, %s41_s25, [#allocation7]  }
   0xa   :  { %3866 = dma.done.wait [#allocation4], 384  }
   0xb   :  { %3867 = vsyncadd [#allocation4], 4294966912 }
   0xc   :  { %3868 = dma.done.wait [#allocation7], 560  }
   0xd   :  { %3869 = vsyncadd [#allocation7], 4294966736  ;;  %v3917_v0 = vld [vmem:[#allocation3] sm:$0xff]  ;;  %s3875_s0 = smov 111   ;;  %s3876_s26 = smov 110   ;;  %v3925_v1 = vld [vmem:[#allocation3 + $0x8] sm:$0xff]  ;;  %v70_v4 = vlaneseq }
   0xe   :  { %134 = vrot.lane.b32.xlu2 %v3917_v0, %s3875_s0  ;;  %147 = vrot.lane.b32.xlu1 %v3917_v0, %s3876_s26  ;;  %s3877_s2 = smov 109   ;;  %s3878_s27 = smov 1   ;;  %v3939_v2 = vld [vmem:[#allocation3 + $0x10] sm:$0xff]  ;;  %v4015_v20 = vand.u32 4294901760, %v3917_v0  ;;  %v57_v38 = vld [vmem:[#allocation8] sm:$0xff]  ;;  %vm200_vm5 = vcmask 588800  }
   0xf   :  { %160 = vrot.lane.b32.xlu0 %v3917_v0, %s3877_s2  ;;  %s3879_s28 = smov 127   ;;  %s3880_s29 = smov 17   ;;  %v3975_v6 = vand.u32 127, %v70_v4  ;;  %v202_v47 = vsel %vm200_vm5, %v57_v38, 0  ;;  %vm964_vm9 = vcmask 64512  }
  0x10   :  { %s3881_s30 = smov 18   ;;  %s3882_s4 = smov 19   ;;  %v4035_v27 = vsub.f32 %v3917_v0, %v4015_v20  ;;  %v4099_v54 = vand.u32 4294901760, %v202_v47 }
  0x11   :  { %vm140_vm0 = vcmp.lt.s32.totalorder %v3975_v6, 111  ;;  %vm153_vm1 = vcmp.lt.s32.totalorder %v3975_v6, 110  ;;  %vm166_vm2 = vcmp.lt.s32.totalorder %v3975_v6, 109  ;;  %vm127_vm3 = vcmp.lt.s32.totalorder %v3975_v6, 127  ;;  %s3887_s5 = smov [#allocation9]   ;;  %s3733_s9 = sshll.u32 %s5293_s3, 4  ;;  %s3734_s9 = int_to_ptr.hbm [resolvable:$true] %s3733_s9 }
  0x12   :  { %v271_v35 = vand.u32 4294901760, %v4035_v27  ;;  %vm98_vm4 = vcmp.lt.s32.totalorder %v3975_v6, 17  ;;  %vm111_vm6 = vcmp.lt.s32.totalorder %v3975_v6, 1  ;;  %vm85_vm7 = vcmp.lt.s32.totalorder %v3975_v6, 18  ;;  %s3731_s6 = sshll.u32 %s3887_s5, 4  ;;  %s3732_s6 = int_to_ptr.vmem [resolvable:$true] %s3731_s6 }
  0x13   :  { %v4115_v59 = vsub.f32 %v202_v47, %v4099_v54  ;;  %vm72_vm8 = vcmp.lt.s32.totalorder %v3975_v6, 19 }
  0x14   :  { %v272_v43 = vsub.f32 %v4035_v27, %v271_v35 }
  0x16   :  { %136 = vrot.lane.b32.xlu2 %v3925_v1, %s3875_s0  ;;  %149 = vrot.lane.b32.xlu1 %v3925_v1, %s3876_s26  ;;  %v273_v53 = vand.u32 4294901760, %v272_v43 }
  0x17   :  { %162 = vrot.lane.b32.xlu0 %v3925_v1, %s3877_s2 }
  0x1e   :  { %105 = vrot.lane.b32.xlu2 %v3917_v0, %s3878_s27  ;;  %123 = vrot.lane.b32.xlu1 %v3925_v1, %s3879_s28 }
  0x1f   :  { %121 = vrot.lane.b32.xlu0 %v3917_v0, %s3879_s28 }
  0x26   :  { %96 = vrot.lane.b32.xlu2 %v3939_v2, %s3880_s29  ;;  %92 = vrot.lane.b32.xlu1 %v3917_v0, %s3880_s29 }
  0x27   :  { %109 = vrot.lane.b32.xlu0 %v3939_v2, %s3878_s27 }
  0x2e   :  { %83 = vrot.lane.b32.xlu2 %v3939_v2, %s3881_s30  ;;  %79 = vrot.lane.b32.xlu1 %v3917_v0, %s3881_s30 }
  0x2f   :  { %164 = vrot.lane.b32.xlu0 %v3939_v2, %s3877_s2 }
  0x36   :  { %68 = vrot.lane.b32.xlu2 %v3939_v2, %s3882_s4  ;;  %64 = vrot.lane.b32.xlu1 %v3917_v0, %s3882_s4 }
  0x37   :  { %151 = vrot.lane.b32.xlu0 %v3939_v2, %s3876_s26 }
  0x3e   :  { %107 = vrot.lane.b32.xlu2 %v3925_v1, %s3878_s27  ;;  %125 = vrot.lane.b32.xlu1 %v3939_v2, %s3879_s28 }
  0x3f   :  { %138 = vrot.lane.b32.xlu0 %v3939_v2, %s3875_s0 }
  0x46   :  { %81 = vrot.lane.b32.xlu1 %v3925_v1, %s3881_s30  ;;  %66 = vrot.lane.b32.xlu2 %v3925_v1, %s3882_s4 }
  0x47   :  { %94 = vrot.lane.b32.xlu0 %v3925_v1, %s3880_s29 }
  0x68   :  { %v3971_v3 = vpop.permute.xlu2 %134 }
  0x70   :  { %v3973_v5 = vpop.permute.xlu2 %136 }
  0x71   :  { %v142_v10 = vsel %vm140_vm0, %v3971_v3, %v3973_v5 }
  0x72   :  { %v3989_v11 = vand.u32 4294901760, %v142_v10 }
  0x74   :  { %v4007_v17 = vsub.f32 %v142_v10, %v3989_v11 }
  0x76   :  { %v259_v25 = vand.u32 4294901760, %v4007_v17 }
  0x78   :  { %v3982_v9 = vpop.permute.xlu2 %105  ;;  %v260_v34 = vsub.f32 %v4007_v17, %v259_v25 }
  0x7a   :  { %v261_v40 = vand.u32 4294901760, %v260_v34 }
  0x80   :  { %v3977_v7 = vpop.permute.xlu1 %147  ;;  %v4017_v21 = vpop.permute.xlu2 %96 }
  0x81   :  { %v3980_v8 = vpop.permute.xlu0 %160 }
  0x88   :  { %v3992_v12 = vpop.permute.xlu1 %149  ;;  %v4065_v39 = vpop.permute.xlu2 %83 }
  0x89   :  { %v155_v13 = vsel %vm153_vm1, %v3977_v7, %v3992_v12  ;;  %v3998_v14 = vpop.permute.xlu0 %162 }
  0x8a   :  { %v4000_v15 = vand.u32 4294901760, %v155_v13  ;;  %v168_v16 = vsel %vm166_vm2, %v3980_v8, %v3998_v14 }
  0x8b   :  { %v4009_v18 = vand.u32 4294901760, %v168_v16 }
  0x8c   :  { %v4012_v19 = vsub.f32 %v155_v13, %v4000_v15 }
  0x8d   :  { %v4020_v22 = vsub.f32 %v168_v16, %v4009_v18  ;;  %212 = vmatpush.msra.mxu0 %v4009_v18  ;;  %352 = vmatpush.msra.mxu3 %v4009_v18 }
  0x8e   :  { %v253_v23 = vand.u32 4294901760, %v4012_v19 }
  0x8f   :  { %214 = vmatpush.msra.mxu0 %v4000_v15  ;;  %313 = vmatpush.msra.mxu2 %v4020_v22  ;;  %v247_v24 = vand.u32 4294901760, %v4020_v22 }
  0x90   :  { %354 = vmatpush.msra.mxu3 %v4000_v15  ;;  %v4031_v26 = vpop.permute.xlu1 %123  ;;  %v254_v30 = vsub.f32 %v4012_v19, %v253_v23  ;;  %v4117_v60 = vpop.permute.xlu2 %68 }
  0x91   :  { %216 = vmatpush.msra.mxu0 %v3989_v11  ;;  %316 = vmatpush.msra.mxu2 %v4012_v19  ;;  %v4039_v28 = vpop.permute.xlu0 %121  ;;  %v248_v29 = vsub.f32 %v4020_v22, %v247_v24 }
  0x92   :  { %356 = vmatpush.msra.mxu3 %v3989_v11  ;;  %v129_v31 = vsel %vm127_vm3, %v4039_v28, %v4031_v26  ;;  %v255_v37 = vand.u32 4294901760, %v254_v30  ;;  %v4146_v30 = vand.u32 4294901760, %v4115_v59 }
  0x93   :  { %v4052_v32 = vand.u32 4294901760, %v129_v31  ;;  %319 = vmatpush.msra.mxu2 %v4007_v17  ;;  %v249_v33 = vand.u32 4294901760, %v248_v29 }
  0x95   :  { %v4060_v36 = vsub.f32 %v129_v31, %v4052_v32  ;;  %218 = vmatpush.msra.mxu0 %v4052_v32  ;;  %250 = vmatpush.msra.mxu1 %v249_v33 }
  0x96   :  { %358 = vmatpush.msra.mxu3 %v4052_v32 }
  0x97   :  { %256 = vmatpush.msra.mxu1 %v255_v37  ;;  %322 = vmatpush.msra.mxu2 %v4060_v36  ;;  %v265_v41 = vand.u32 4294901760, %v4060_v36 }
  0x98   :  { %v4070_v42 = vpop.permute.xlu1 %92  ;;  %220 = vmatpush.msra.mxu0 %v4015_v20  ;;  %360 = vmatpush.msra.mxu3 %v4015_v20 }
  0x99   :  { %v101_v44 = vsel %vm98_vm4, %v4017_v21, %v4070_v42  ;;  %262 = vmatpush.msra.mxu1 %v261_v40  ;;  %v4081_v45 = vpop.permute.xlu0 %109  ;;  %v266_v46 = vsub.f32 %v4060_v36, %v265_v41  ;;  %325 = vmatpush.msra.mxu2 %v4035_v27  ;;  %v232_v40 = vsub.f32 %v4115_v59, %v4146_v30 }
  0x9a   :  { %v4088_v48 = vand.u32 4294901760, %v101_v44  ;;  %v114_v49 = vsel %vm111_vm6, %v4081_v45, %v3982_v9 }
  0x9b   :  { %v4094_v50 = vand.u32 4294901760, %v114_v49  ;;  %v267_v51 = vand.u32 4294901760, %v266_v46 }
  0x9c   :  { %v4097_v52 = vsub.f32 %v101_v44, %v4088_v48 }
  0x9d   :  { %v4102_v55 = vsub.f32 %v114_v49, %v4094_v50  ;;  %222 = vmatpush.msra.mxu0 %v4094_v50  ;;  %268 = vmatpush.msra.mxu1 %v267_v51  ;;  %v4174_v51 = vpop.permute.xlu2 %107 }
  0x9e   :  { %362 = vmatpush.msra.mxu3 %v4094_v50  ;;  %v283_v56 = vand.u32 4294901760, %v4097_v52 }
  0x9f   :  { %224 = vmatpush.msra.mxu0 %v4088_v48  ;;  %328 = vmatpush.msra.mxu2 %v4102_v55  ;;  %v277_v57 = vand.u32 4294901760, %v4102_v55 }
  0xa0   :  { %364 = vmatpush.msra.mxu3 %v4088_v48  ;;  %v4112_v58 = vpop.permute.xlu1 %79  ;;  %274 = vmatpush.msra.mxu1 %v273_v53  ;;  %v284_v0 = vsub.f32 %v4097_v52, %v283_v56 }
  0xa1   :  { %v88_v61 = vsel %vm85_vm7, %v4065_v39, %v4112_v58  ;;  %v4123_v62 = vpop.permute.xlu0 %164  ;;  %331 = vmatpush.msra.mxu2 %v4097_v52  ;;  %v278_v63 = vsub.f32 %v4102_v55, %v277_v57 }
  0xa2   :  { %v4132_v4 = vand.u32 4294901760, %v88_v61  ;;  %v167_v10 = vsel %vm166_vm2, %v3998_v14, %v4123_v62  ;;  %v285_v33 = vand.u32 4294901760, %v284_v0 }
  0xa3   :  { %v4138_v13 = vand.u32 4294901760, %v167_v10  ;;  %v279_v16 = vand.u32 4294901760, %v278_v63 }
  0xa4   :  { %v4141_v29 = vsub.f32 %v88_v61, %v4132_v4  ;;  %226 = vmatpush.msra.mxu0 %v4132_v4  ;;  %366 = vmatpush.msra.mxu3 %v4132_v4 }
  0xa5   :  { %v4149_v31 = vsub.f32 %v167_v10, %v4138_v13  ;;  %280 = vmatpush.msra.mxu1 %v279_v16  ;;  %v4183_v10 = vand.u32 4294901760, %v232_v40 }
  0xa6   :  { %334 = vmatpush.msra.mxu2 %v4141_v29  ;;  %v289_v14 = vand.u32 4294901760, %v4141_v29 }
  0xa7   :  { %286 = vmatpush.msra.mxu1 %v285_v33  ;;  %v497_v34 = vand.u32 4294901760, %v4149_v31 }
  0xa8   :  { %v65_v37 = vpop.permute.xlu1 %64  ;;  %v290_v38 = vsub.f32 %v4141_v29, %v289_v14 }
  0xa9   :  { %v75_v43 = vsel %vm72_vm8, %v4117_v60, %v65_v37  ;;  %v4163_v44 = vpop.permute.xlu0 %151  ;;  %v498_v46 = vsub.f32 %v4149_v31, %v497_v34 }
  0xaa   :  { %v4168_v47 = vand.u32 4294901760, %v75_v43  ;;  %v154_v49 = vsel %vm153_vm1, %v3992_v12, %v4163_v44  ;;  %v291_v61 = vand.u32 4294901760, %v290_v38  ;;  %v113_v12 = vsel %vm111_vm6, %v3982_v9, %v4174_v51 }
  0xab   :  { %v4176_v53 = vand.u32 4294901760, %v154_v49  ;;  %v499_v63 = vand.u32 4294901760, %v498_v46  ;;  %v4197_v38 = vand.u32 4294901760, %v3925_v1  ;;  %v4208_v9 = vand.u32 4294901760, %v113_v12 }
  0xac   :  { %v4179_v0 = vsub.f32 %v75_v43, %v4168_v47  ;;  %228 = vmatpush.msra.mxu0 %v4168_v47  ;;  %368 = vmatpush.msra.mxu3 %v4168_v47 }
  0xad   :  { %v4186_v16 = vsub.f32 %v154_v49, %v4176_v53  ;;  %292 = vmatpush.msra.mxu1 %v291_v61  ;;  %234 = vmatmul.f32.vlgmr.msra.gmra.mxu0 %v4183_v10 }
  0xae   :  { %386 = vmatpush.msrb.mxu0 %v247_v24  ;;  %500 = vmatpush.msrb.mxu3 %v499_v63  ;;  %v295_v33 = vand.u32 4294901760, %v4179_v0 }
  0xaf   :  { %337 = vmatpush.msra.mxu2 %v4179_v0  ;;  %v5294_v22 = vand.u32 4294901760, %v4186_v16  ;;  %372 = vmatmul.f32.vlgmr.msra.gmra.mxu3 %v4146_v30 }
  0xb0   :  { %390 = vmatpush.msrb.mxu0 %v253_v23  ;;  %v4203_v24 = vpop.permute.xlu1 %125  ;;  %v296_v40 = vsub.f32 %v4179_v0, %v295_v33  ;;  %340 = vmatmul.f32.vlgmr.msra.gmra.mxu2 %v4115_v59  ;;  %v4241_v0 = vsub.f32 %v113_v12, %v4208_v9 }
  0xb1   :  { %462 = vmatpush.msrb.mxu2 %v4138_v13  ;;  %v128_v19 = vsel %vm127_vm3, %v4031_v26, %v4203_v24  ;;  %v4214_v23 = vpop.permute.xlu0 %138  ;;  %v504_v43 = vsub.f32 %v4186_v16, %v5294_v22  ;;  %v4231_v26 = vsub.f32 %v3925_v1, %v4197_v38 }
  0xb2   :  { %394 = vmatpush.msrb.mxu0 %v259_v25  ;;  %v4222_v46 = vand.u32 4294901760, %v128_v19  ;;  %v141_v49 = vsel %vm140_vm0, %v3973_v5, %v4214_v23  ;;  %v297_v25 = vand.u32 4294901760, %v296_v40  ;;  %v4243_v5 = vpop.permute.xlu2 %66  ;;  %v527_v55 = vand.u32 4294901760, %v4241_v0 }
  0xb3   :  { %464 = vmatpush.msrb.mxu2 %v4176_v53  ;;  %v4233_v17 = vand.u32 4294901760, %v141_v49  ;;  %v505_v61 = vand.u32 4294901760, %v504_v43  ;;  %v74_v1 = vsel %vm72_vm8, %v65_v37, %v4243_v5 }
  0xb4   :  { %398 = vmatpush.msrb.mxu0 %v265_v41  ;;  %v4238_v63 = vsub.f32 %v128_v19, %v4222_v46  ;;  %298 = vmatpush.msra.mxu1 %v297_v25  ;;  %v521_v41 = vand.u32 4294901760, %v4231_v26  ;;  %v4264_v37 = vand.u32 4294901760, %v74_v1 }
  0xb5   :  { %v4246_v22 = vsub.f32 %v141_v49, %v4233_v17  ;;  %466 = vmatpush.msrb.mxu2 %v4233_v17  ;;  %506 = vmatpush.msrb.mxu3 %v505_v61  ;;  %v528_v61 = vsub.f32 %v4241_v0, %v527_v55 }
  0xb6   :  { %402 = vmatpush.msrb.mxu0 %v271_v35  ;;  %v515_v36 = vand.u32 4294901760, %v4238_v63  ;;  %432 = vmatpush.msrb.mxu1 %v4009_v18  ;;  %v522_v19 = vsub.f32 %v4231_v26, %v521_v41  ;;  %v4300_v52 = vsub.f32 %v74_v1, %v4264_v37 }
  0xb7   :  { %468 = vmatpush.msrb.mxu2 %v4222_v46  ;;  %v509_v12 = vand.u32 4294901760, %v4246_v22  ;;  %300 = vmatmul.f32.vlgmr.msra.gmra.mxu1 %v4099_v54  ;;  %v529_v1 = vand.u32 4294901760, %v528_v61 }
  0xb8   :  { %406 = vmatpush.msrb.mxu0 %v277_v57  ;;  %v4261_v40 = vpop.permute.xlu1 %81  ;;  %434 = vmatpush.msrb.mxu1 %v4000_v15  ;;  %v523_v25 = vand.u32 4294901760, %v522_v19 }
  0xb9   :  { %v87_v18 = vsel %vm85_vm7, %v4112_v58, %v4261_v40  ;;  %v4271_v27 = vpop.permute.xlu0 %94  ;;  %470 = vmatpush.msrb.mxu2 %v4197_v38  ;;  %v510_v35 = vsub.f32 %v4246_v22, %v509_v12  ;;  %v516_v58 = vsub.f32 %v4238_v63, %v515_v36 }
  0xba   :  { %v4276_v57 = vand.u32 4294901760, %v87_v18  ;;  %v100_v15 = vsel %vm98_vm4, %v4070_v42, %v4271_v27  ;;  %410 = vmatpush.msrb.mxu0 %v283_v56  ;;  %436 = vmatpush.msrb.mxu1 %v3989_v11 }
  0xbb   :  { %v4290_v43 = vand.u32 4294901760, %v100_v15  ;;  %472 = vmatpush.msrb.mxu2 %v4208_v9  ;;  %v511_v49 = vand.u32 4294901760, %v510_v35  ;;  %v517_v11 = vand.u32 4294901760, %v516_v58 }
  0xbc   :  { %v4295_v42 = vsub.f32 %v87_v18, %v4276_v57  ;;  %414 = vmatpush.msrb.mxu0 %v289_v14  ;;  %438 = vmatpush.msrb.mxu1 %v4052_v32 }
  0xbd   :  { %v532_v56 = vsub.f32 %v100_v15, %v4290_v43  ;;  %474 = vmatpush.msrb.mxu2 %v4290_v43  ;;  %512 = vmatpush.msrb.mxu3 %v511_v49 }
  0xbe   :  { %418 = vmatpush.msrb.mxu0 %v295_v33  ;;  %440 = vmatpush.msrb.mxu1 %v4015_v20  ;;  %v539_v14 = vand.u32 4294901760, %v4295_v42  ;;  %v545_v33 = vand.u32 4294901760, %v4300_v52 }
  0xbf   :  { %476 = vmatpush.msrb.mxu2 %v4276_v57  ;;  %v533_v29 = vand.u32 4294901760, %v532_v56  ;;  %518 = vmatpush.msrb.mxu3 %v517_v11 }
  0xc0   :  { %563 = vmatpush.msra.mxu0 %v4149_v31  ;;  %442 = vmatpush.msrb.mxu1 %v4094_v50  ;;  %v540_v18 = vsub.f32 %v4295_v42, %v539_v14  ;;  %v5305_v50 = vand.u32 4294901760, %v4186_v16  ;;  %v546_v35 = vsub.f32 %v4300_v52, %v545_v33  ;;  %v169_v31 = vsel %vm166_vm2, %v4123_v62, %v3980_v8 }
  0xc1   :  { %478 = vmatpush.msrb.mxu2 %v4264_v37  ;;  %v534_v32 = vsub.f32 %v532_v56, %v533_v29  ;;  %524 = vmatpush.msrb.mxu3 %v523_v25 }
  0xc2   :  { %566 = vmatpush.msra.mxu0 %v4186_v16  ;;  %444 = vmatpush.msrb.mxu1 %v4088_v48  ;;  %v541_v48 = vand.u32 4294901760, %v540_v18 }
  0xc3   :  { %636 = vmatpush.msra.mxu2 %v497_v34  ;;  %v535_v20 = vand.u32 4294901760, %v534_v32  ;;  %530 = vmatpush.msrb.mxu3 %v529_v1  ;;  %v156_v34 = vsel %vm153_vm1, %v4163_v44, %v3977_v7  ;;  %v143_v7 = vsel %vm140_vm0, %v4214_v23, %v3971_v3  ;;  %v130_v3 = vsel %vm127_vm3, %v4203_v24, %v4039_v28 }
  0xc4   :  { %569 = vmatpush.msra.mxu0 %v4246_v22  ;;  %446 = vmatpush.msrb.mxu1 %v4132_v4  ;;  %v547_v4 = vand.u32 4294901760, %v546_v35  ;;  %v4347_v8 = vand.u32 4294901760, %v156_v34  ;;  %v4366_v44 = vand.u32 4294901760, %v143_v7  ;;  %v112_v28 = vsel %vm111_vm6, %v4174_v51, %v4081_v45 }
  0xc5   :  { %640 = vmatpush.msra.mxu2 %v5305_v50  ;;  %420 = vmatmul.f32.vlgmr.msrb.gmra.mxu0 %v4099_v54  ;;  %v4380_v16 = vand.u32 4294901760, %v130_v3  ;;  %v4385_v22 = vand.u32 4294901760, %v3939_v2  ;;  %v4394_v51 = vand.u32 4294901760, %v112_v28  ;;  %v99_v23 = vsel %vm98_vm4, %v4271_v27, %v4017_v21 }
  0xc6   :  { %536 = vmatpush.msrb.mxu3 %v535_v20  ;;  %572 = vmatpush.msra.mxu0 %v4238_v63  ;;  %v4388_v24 = vsub.f32 %v143_v7, %v4366_v44  ;;  %v86_v21 = vsel %vm85_vm7, %v4261_v40, %v4065_v39  ;;  %v4421_v63 = vand.u32 4294901760, %v99_v23  ;;  %v73_v39 = vsel %vm72_vm8, %v4243_v5, %v4117_v60 }
  0xc7   :  { %448 = vmatpush.msrb.mxu1 %v4168_v47  ;;  %644 = vmatpush.msra.mxu2 %v509_v12  ;;  %v4341_v47 = vand.u32 4294901760, %v169_v31  ;;  %v4448_v5 = vand.u32 4294901760, %v73_v39 }
  0xc8   :  { %450 = vmatmul.f32.vlgmr.msrb.gmra.mxu1 %v4099_v54  ;;  %542 = vmatpush.msrb.mxu3 %v541_v48  ;;  %v4451_v40 = vsub.f32 %v99_v23, %v4421_v63 }
  0xc9   :  { %575 = vmatpush.msra.mxu0 %v4231_v26  ;;  %602 = vmatpush.msra.mxu1 %v4138_v13  ;;  %v4358_v62 = vsub.f32 %v169_v31, %v4341_v47  ;;  %v4406_v26 = vsub.f32 %v130_v3, %v4380_v16 }
  0xca   :  { %648 = vmatpush.msra.mxu2 %v515_v36  ;;  %548 = vmatpush.msrb.mxu3 %v547_v4 }
  0xcb   :  { %578 = vmatpush.msra.mxu0 %v4241_v0  ;;  %604 = vmatpush.msra.mxu1 %v4176_v53  ;;  %v4429_v0 = vsub.f32 %v112_v28, %v4394_v51 }
  0xcc   :  { %652 = vmatpush.msra.mxu2 %v521_v41  ;;  %682 = vmatpush.msra.mxu3 %v4138_v13  ;;  %v4370_v13 = vsub.f32 %v156_v34, %v4347_v8  ;;  %v765_v41 = vand.u32 4294901760, %v4406_v26 }
  0xcd   :  { %581 = vmatpush.msra.mxu0 %v532_v56  ;;  %606 = vmatpush.msra.mxu1 %v4233_v17  ;;  %v777_v58 = vand.u32 4294901760, %v4429_v0 }
  0xce   :  { %656 = vmatpush.msra.mxu2 %v527_v55  ;;  %684 = vmatpush.msra.mxu3 %v4176_v53  ;;  %v747_v53 = vand.u32 4294901760, %v4358_v62  ;;  %v753_v45 = vand.u32 4294901760, %v4370_v13 }
  0xcf   :  { %584 = vmatpush.msra.mxu0 %v4295_v42  ;;  %608 = vmatpush.msra.mxu1 %v4222_v46 }
  0xd0   :  { %660 = vmatpush.msra.mxu2 %v533_v29  ;;  %686 = vmatpush.msra.mxu3 %v4233_v17  ;;  %v759_v17 = vand.u32 4294901760, %v4388_v24 }
  0xd1   :  { %587 = vmatpush.msra.mxu0 %v4300_v52  ;;  %610 = vmatpush.msra.mxu1 %v4197_v38  ;;  %v778_v52 = vsub.f32 %v4429_v0, %v777_v58 }
  0xd2   :  { %664 = vmatpush.msra.mxu2 %v539_v14  ;;  %688 = vmatpush.msra.mxu3 %v4222_v46  ;;  %v748_v46 = vsub.f32 %v4358_v62, %v747_v53  ;;  %v760_v60 = vsub.f32 %v4388_v24, %v759_v17 }
  0xd3   :  { %712 = vmatpush.msrb.mxu0 %v4341_v47  ;;  %484 = vmatmul.f32.vlgmr.msrb.gmra.mxu2 %v4183_v10  ;;  %v779_v61 = vand.u32 4294901760, %v778_v52 }
  0xd4   :  { %612 = vmatpush.msra.mxu1 %v4208_v9  ;;  %668 = vmatpush.msra.mxu2 %v545_v33  ;;  %v749_v36 = vand.u32 4294901760, %v748_v46  ;;  %v761_v19 = vand.u32 4294901760, %v760_v60 }
  0xd5   :  { %690 = vmatpush.msra.mxu3 %v4197_v38  ;;  %714 = vmatpush.msrb.mxu0 %v4347_v8  ;;  %v4412_v38 = vsub.f32 %v3939_v2, %v4385_v22  ;;  %v754_v2 = vsub.f32 %v4370_v13, %v753_v45 }
  0xd6   :  { %550 = vmatmul.f32.vlgmr.msrb.gmra.mxu3 %v4099_v54  ;;  %614 = vmatpush.msra.mxu1 %v4290_v43 }
  0xd7   :  { %813 = vmatpush.msrb.mxu2 %v4358_v62  ;;  %692 = vmatpush.msra.mxu3 %v4208_v9  ;;  %v4437_v9 = vand.u32 4294901760, %v86_v21  ;;  %v771_v12 = vand.u32 4294901760, %v4412_v38  ;;  %v755_v27 = vand.u32 4294901760, %v754_v2 }
  0xd8   :  { %716 = vmatpush.msrb.mxu0 %v4366_v44  ;;  %616 = vmatpush.msra.mxu1 %v4276_v57 }
  0xd9   :  { %816 = vmatpush.msrb.mxu2 %v4370_v13  ;;  %694 = vmatpush.msra.mxu3 %v4290_v43  ;;  %v788_v55 = vsub.f32 %v86_v21, %v4437_v9  ;;  %v772_v15 = vsub.f32 %v4412_v38, %v771_v12  ;;  %v783_v43 = vand.u32 4294901760, %v4451_v40 }
  0xda   :  { %718 = vmatpush.msrb.mxu0 %v4380_v16  ;;  %618 = vmatpush.msra.mxu1 %v4264_v37 }
  0xdb   :  { %819 = vmatpush.msrb.mxu2 %v4388_v24  ;;  %696 = vmatpush.msra.mxu3 %v4276_v57  ;;  %v766_v57 = vsub.f32 %v4406_v26, %v765_v41  ;;  %v773_v42 = vand.u32 4294901760, %v772_v15  ;;  %v789_v56 = vand.u32 4294901760, %v788_v55  ;;  %v784_v11 = vsub.f32 %v4451_v40, %v783_v43 }
  0xdc   :  { %720 = vmatpush.msrb.mxu0 %v4385_v22  ;;  %750 = vmatpush.msrb.mxu1 %v749_v36 }
  0xdd   :  { %670 = vmatmul.f32.vlgmr.msra.gmra.mxu2 %v4099_v54  ;;  %698 = vmatpush.msra.mxu3 %v4264_v37  ;;  %v794_v37 = vsub.f32 %v73_v39, %v4448_v5  ;;  %v767_v49 = vand.u32 4294901760, %v766_v57  ;;  %v790_v29 = vsub.f32 %v788_v55, %v789_v56  ;;  %v785_v14 = vand.u32 4294901760, %v784_v11 }
  0xde   :  { %822 = vmatpush.msrb.mxu2 %v4406_v26  ;;  %722 = vmatpush.msrb.mxu0 %v4394_v51 }
  0xdf   :  { %756 = vmatpush.msrb.mxu1 %v755_v27  ;;  %590 = vmatmul.f32.vlgmr.msra.gmra.mxu0 %v4115_v59  ;;  %v795_v25 = vand.u32 4294901760, %v794_v37  ;;  %v791_v33 = vand.u32 4294901760, %v790_v29 }
  0xe0   :  { %700 = vmatmul.f32.vlgmr.msra.gmra.mxu3 %v4099_v54  ;;  %825 = vmatpush.msrb.mxu2 %v4412_v38 }
  0xe1   :  { %852 = vmatpush.msrb.mxu3 %v4341_v47  ;;  %724 = vmatpush.msrb.mxu0 %v4421_v63  ;;  %v796_v32 = vsub.f32 %v794_v37, %v795_v25 }
  0xe2   :  { %762 = vmatpush.msrb.mxu1 %v761_v19  ;;  %828 = vmatpush.msrb.mxu2 %v4429_v0 }
  0xe3   :  { %622 = vmatmul.f32.vlgmr.msra.gmra.mxu1 %v4146_v30  ;;  %854 = vmatpush.msrb.mxu3 %v4347_v8  ;;  %v797_v1 = vand.u32 4294901760, %v796_v32 }
  0xe4   :  { %726 = vmatpush.msrb.mxu0 %v4437_v9  ;;  %768 = vmatpush.msrb.mxu1 %v767_v49 }
  0xe5   :  { %831 = vmatpush.msrb.mxu2 %v4451_v40  ;;  %856 = vmatpush.msrb.mxu3 %v4366_v44 }
  0xe6   :  { %728 = vmatpush.msrb.mxu0 %v4448_v5  ;;  %774 = vmatpush.msrb.mxu1 %v773_v42 }
  0xe7   :  { %834 = vmatpush.msrb.mxu2 %v788_v55  ;;  %858 = vmatpush.msrb.mxu3 %v4380_v16 }
  0xe8   :  { %886 = vmatpush.msra.mxu0 %v747_v53  ;;  %780 = vmatpush.msrb.mxu1 %v779_v61 }
  0xe9   :  { %837 = vmatpush.msrb.mxu2 %v794_v37  ;;  %860 = vmatpush.msrb.mxu3 %v4385_v22 }
  0xea   :  { %890 = vmatpush.msra.mxu0 %v753_v45  ;;  %786 = vmatpush.msrb.mxu1 %v785_v14 }
  0xeb   :  { %840 = vmatmul.f32.vlgmr.msrb.gmra.mxu2 %v4115_v59  ;;  %862 = vmatpush.msrb.mxu3 %v4394_v51  ;;  %v59_v59 = vld [vmem:[#allocation8 + $0x10] sm:$0xff] }
  0xec   :  { %894 = vmatpush.msra.mxu0 %v759_v17  ;;  %792 = vmatpush.msrb.mxu1 %v791_v33 }
  0xed   :  { %734 = vmatmul.f32.vlgmr.msrb.gmra.mxu0 %v4183_v10  ;;  %864 = vmatpush.msrb.mxu3 %v4421_v63  ;;  %v966_v10 = vsel %vm964_vm9, %v59_v59, 0 }
  0xee   :  { %898 = vmatpush.msra.mxu0 %v765_v41  ;;  %798 = vmatpush.msrb.mxu1 %v797_v1  ;;  %v4508_v35 = vand.u32 4294901760, %v966_v10 }
  0xef   :  { %866 = vmatpush.msrb.mxu3 %v4437_v9  ;;  %800 = vmatmul.f32.vlgmr.msrb.gmra.mxu1 %v4099_v54 }
  0xf0   :  { %902 = vmatpush.msra.mxu0 %v771_v12  ;;  %932 = vmatpush.msra.mxu1 %v4341_v47  ;;  %v4511_v4 = vsub.f32 %v966_v10, %v4508_v35  ;;  %v4513_v47 = vld [vmem:[#allocation6] sm:$0x7] }
  0xf1   :  { %868 = vmatpush.msrb.mxu3 %v4448_v5  ;;  %v4519_v62 = vperm.slane %v4513_v47, 0  ;;  %v4557_v52 = vperm.slane %v4513_v47, 2 }
  0xf2   :  { %906 = vmatpush.msra.mxu0 %v777_v58  ;;  %934 = vmatpush.msra.mxu1 %v4347_v8  ;;  %v4516_v8 = vand.u32 4294901760, %v4511_v4 }
  0xf3   :  { %872 = vmatmul.f32.vlgmr.msrb.gmra.mxu3 %v4146_v30  ;;  %5306 = vst [vmem:[#allocation13_spill] sm:$0xff] %v4557_v52 }
  0xf4   :  { %910 = vmatpush.msra.mxu0 %v783_v43  ;;  %936 = vmatpush.msra.mxu1 %v4366_v44  ;;  %v988_v44 = vsub.f32 %v4511_v4, %v4516_v8 }
  0xf6   :  { %914 = vmatpush.msra.mxu0 %v789_v56  ;;  %938 = vmatpush.msra.mxu1 %v4380_v16  ;;  %v4529_v53 = vand.u32 4294901760, %v988_v44 }
  0xf8   :  { %918 = vmatpush.msra.mxu0 %v795_v25  ;;  %940 = vmatpush.msra.mxu1 %v4385_v22 }
  0xf9   :  { %920 = vmatmul.f32.vlgmr.msra.gmra.mxu0 %v4099_v54 }
  0xfa   :  { %942 = vmatpush.msra.mxu1 %v4394_v51 }
  0xfc   :  { %944 = vmatpush.msra.mxu1 %v4421_v63 }
  0xfe   :  { %946 = vmatpush.msra.mxu1 %v4437_v9  ;;  %v4539_v9 = vperm.slane %v4513_v47, 1 }
 0x100   :  { %948 = vmatpush.msra.mxu1 %v4448_v5 }
 0x101   :  { %950 = vmatmul.f32.vlgmr.msra.gmra.mxu1 %v4099_v54 }
 0x12a   :  { %v235_v20 = vpop.f32.mrf.mxu0 }
 0x132   :  { %v373_v31 = vpop.f32.mrf.mxu3 }
 0x133   :  { %v341_v50 = vpop.f32.mrf.mxu2 }
 0x134   :  { %v301_v30 = vpop.f32.mrf.mxu1 }
 0x135   :  { %v302_v18 = vadd.f32 %v301_v30, %v235_v20 }
 0x137   :  { %v342_v48 = vadd.f32 %v341_v50, %v302_v18 }
 0x139   :  { %v374_v34 = vadd.f32 %v373_v31, %v342_v48 }
 0x142   :  { %v421_v54 = vpop.f32.mrf.mxu0 }
 0x143   :  { %v422_v7 = vadd.f32 %v421_v54, %v374_v34 }
 0x145   :  { %v451_v3 = vpop.f32.mrf.mxu1 }
 0x146   :  { %v4523_v13 = vadd.f32 %v451_v3, %v422_v7 }
 0x148   :  { %v4527_v28 = vmul.f32 %v4519_v62, %v4523_v13 }
 0x14a   :  { %v983_v16 = vand.u32 4294901760, %v4527_v28 }
 0x14c   :  { %984 = vmatpush.msra.mxu2 %v983_v16  ;;  %v1010_v22 = vsub.f32 %v4527_v28, %v983_v16 }
 0x14d   :  { %990 = vmatmul.f32.vlgmr.msra.gmra.mxu2 %v4529_v53 }
 0x14e   :  { %1037 = vmatpush.msrb.mxu2 %v1010_v22  ;;  %v1011_v24 = vand.u32 4294901760, %v1010_v22 }
 0x150   :  { %v1012_v45 = vsub.f32 %v1010_v22, %v1011_v24  ;;  %1086 = vmatpush.msra.mxu2 %v1011_v24 }
 0x152   :  { %v1013_v51 = vand.u32 4294901760, %v1012_v45 }
 0x154   :  { %1014 = vmatpush.msra.mxu3 %v1013_v51 }
 0x155   :  { %1016 = vmatmul.f32.vlgmr.msra.gmra.mxu3 %v4508_v35  ;;  %1040 = vmatmul.f32.vlgmr.msrb.gmra.mxu2 %v4511_v4 }
 0x156   :  { %1060 = vmatpush.msrb.mxu3 %v983_v16  ;;  %v485_v23 = vpop.f32.mrf.mxu2 }
 0x158   :  { %1108 = vmatpush.msra.mxu3 %v983_v16 }
 0x159   :  { %v551_v46 = vpop.f32.mrf.mxu3 }
 0x15a   :  { %v552_v26 = vadd.f32 %v551_v46, %v485_v23 }
 0x15c   :  { %v591_v38 = vpop.f32.mrf.mxu0 }
 0x15d   :  { %1064 = vmatmul.f32.vlgmr.msrb.gmra.mxu3 %v4516_v8  ;;  %1088 = vmatmul.f32.vlgmr.msra.gmra.mxu2 %v4508_v35  ;;  %v592_v21 = vadd.f32 %v591_v38, %v552_v26 }
 0x160   :  { %v623_v17 = vpop.f32.mrf.mxu1  ;;  %v671_v63 = vpop.f32.mrf.mxu2 }
 0x161   :  { %v624_v2 = vadd.f32 %v623_v17, %v592_v21 }
 0x163   :  { %v672_v0 = vadd.f32 %v671_v63, %v624_v2  ;;  %v701_v39 = vpop.f32.mrf.mxu3 }
 0x165   :  { %v4541_v36 = vadd.f32 %v701_v39, %v672_v0  ;;  %1110 = vmatmul.f32.vlgmr.msra.gmra.mxu3 %v4508_v35 }
 0x167   :  { %v4546_v41 = vmul.f32 %v4539_v9, %v4541_v36 }
 0x169   :  { %v1129_v12 = vand.u32 4294901760, %v4546_v41 }
 0x16a   :  { %v735_v27 = vpop.f32.mrf.mxu0 }
 0x16b   :  { %v1156_v60 = vsub.f32 %v4546_v41, %v1129_v12  ;;  %1130 = vmatpush.msrb.mxu0 %v1129_v12  ;;  %1206 = vmatpush.msrb.mxu3 %v1129_v12 }
 0x16c   :  { %1136 = vmatmul.f32.vlgmr.msrb.gmra.mxu0 %v4529_v53  ;;  %v801_v55 = vpop.f32.mrf.mxu1 }
 0x16d   :  { %1183 = vmatpush.msrb.mxu2 %v1156_v60  ;;  %1210 = vmatmul.f32.vlgmr.msrb.gmra.mxu3 %v4516_v8  ;;  %v1157_v5 = vand.u32 4294901760, %v1156_v60  ;;  %v802_v15 = vadd.f32 %v801_v55, %v735_v27 }
 0x16e   :  { %1186 = vmatmul.f32.vlgmr.msrb.gmra.mxu2 %v4511_v4  ;;  %v841_v58 = vpop.f32.mrf.mxu2 }
 0x16f   :  { %v1158_v40 = vsub.f32 %v1156_v60, %v1157_v5  ;;  %1232 = vmatpush.msra.mxu0 %v1157_v5  ;;  %v842_v19 = vadd.f32 %v841_v58, %v802_v15 }
 0x171   :  { %v1159_v57 = vand.u32 4294901760, %v1158_v40 }
 0x173   :  { %1160 = vmatpush.msrb.mxu1 %v1159_v57 }
 0x174   :  { %1162 = vmatmul.f32.vlgmr.msrb.gmra.mxu1 %v4508_v35  ;;  %1234 = vmatmul.f32.vlgmr.msra.gmra.mxu0 %v4508_v35 }
 0x175   :  { %1254 = vmatpush.msra.mxu1 %v1129_v12 }
 0x176   :  { %v873_v37 = vpop.f32.mrf.mxu3  ;;  %v921_v49 = vpop.f32.mrf.mxu0 }
 0x177   :  { %v874_v43 = vadd.f32 %v873_v37, %v842_v19 }
 0x179   :  { %v922_v42 = vadd.f32 %v921_v49, %v874_v43 }
 0x17c   :  { %1256 = vmatmul.f32.vlgmr.msra.gmra.mxu1 %v4508_v35 }
 0x17e   :  { %v951_v56 = vpop.f32.mrf.mxu1 }
 0x17f   :  { %v4559_v11 = vadd.f32 %v951_v56, %v922_v42 }
 0x181   :  { %v963_v25 = vmul.f32 %v4557_v52, %v4559_v11 }
 0x183   :  { %v1275_v61 = vand.u32 4294901760, %v963_v25 }
 0x185   :  { %v1302_v29 = vsub.f32 %v963_v25, %v1275_v61  ;;  %1276 = vmatpush.msra.mxu2 %v1275_v61  ;;  %1352 = vmatpush.msrb.mxu1 %v1275_v61 }
 0x186   :  { %1282 = vmatmul.f32.vlgmr.msra.gmra.mxu2 %v4529_v53  ;;  %1356 = vmatmul.f32.vlgmr.msrb.gmra.mxu1 %v4516_v8 }
 0x187   :  { %1329 = vmatpush.msrb.mxu0 %v1302_v29  ;;  %v1303_v14 = vand.u32 4294901760, %v1302_v29 }
 0x188   :  { %1332 = vmatmul.f32.vlgmr.msrb.gmra.mxu0 %v4511_v4 }
 0x189   :  { %1378 = vmatpush.msrb.mxu2 %v1303_v14  ;;  %v1304_v32 = vsub.f32 %v1302_v29, %v1303_v14 }
 0x18b   :  { %v1305_v33 = vand.u32 4294901760, %v1304_v32 }
 0x18d   :  { %1306 = vmatpush.msra.mxu3 %v1305_v33 }
 0x18e   :  { %1308 = vmatmul.f32.vlgmr.msra.gmra.mxu3 %v4508_v35  ;;  %1380 = vmatmul.f32.vlgmr.msrb.gmra.mxu2 %v4508_v35 }
 0x18f   :  { %1400 = vmatpush.msrb.mxu3 %v1275_v61 }
 0x196   :  { %1402 = vmatmul.f32.vlgmr.msrb.gmra.mxu3 %v4508_v35 }
 0x1d0   :  { %v991_v1 = vpop.f32.mrf.mxu2 }
 0x1d8   :  { %v1017_v59 = vpop.f32.mrf.mxu3  ;;  %v1041_v30 = vpop.f32.mrf.mxu2 }
 0x1d9   :  { %v1018_v47 = vadd.f32 %v1017_v59, %v991_v1 }
 0x1db   :  { %v1042_v22 = vadd.f32 %v1041_v30, %v1018_v47 }
 0x1e0   :  { %v1065_v10 = vpop.f32.mrf.mxu3  ;;  %v1089_v20 = vpop.f32.mrf.mxu2 }
 0x1e1   :  { %v1066_v45 = vadd.f32 %v1065_v10, %v1042_v22 }
 0x1e3   :  { %v1090_v21 = vadd.f32 %v1089_v20, %v1066_v45 }
 0x1e8   :  { %v1111_v18 = vpop.f32.mrf.mxu3 }
 0x1e9   :  { %v1137_v50 = vpop.f32.mrf.mxu0  ;;  %v1112_v39 = vadd.f32 %v1111_v18, %v1090_v21 }
 0x1f0   :  { %v1211_v54 = vpop.f32.mrf.mxu3 }
 0x1f1   :  { %v1163_v48 = vpop.f32.mrf.mxu1  ;;  %v1187_v31 = vpop.f32.mrf.mxu2 }
 0x1f2   :  { %v1164_v34 = vadd.f32 %v1163_v48, %v1137_v50  ;;  %v1235_v7 = vpop.f32.mrf.mxu0 }
 0x1f4   :  { %v1188_v3 = vadd.f32 %v1187_v31, %v1164_v34 }
 0x1f6   :  { %v1212_v24 = vadd.f32 %v1211_v54, %v1188_v3 }
 0x1f8   :  { %v1236_v46 = vadd.f32 %v1235_v7, %v1212_v24 }
 0x1f9   :  { %v1257_v44 = vpop.f32.mrf.mxu1 }
 0x1fa   :  { %v1258_v2 = vadd.f32 %v1257_v44, %v1236_v46 }
 0x1fc   :  { %v1406_v5 = vadd.f32 %v1258_v2, %v1112_v39 }
 0x203   :  { %v1357_v38 = vpop.f32.mrf.mxu1 }
 0x205   :  { %v1333_v23 = vpop.f32.mrf.mxu0 }
 0x209   :  { %v1283_v16 = vpop.f32.mrf.mxu2 }
 0x211   :  { %v1309_v51 = vpop.f32.mrf.mxu3  ;;  %v1381_v63 = vpop.f32.mrf.mxu2 }
 0x212   :  { %v1310_v26 = vadd.f32 %v1309_v51, %v1283_v16 }
 0x214   :  { %v1334_v17 = vadd.f32 %v1333_v23, %v1310_v26 }
 0x216   :  { %v1358_v0 = vadd.f32 %v1357_v38, %v1334_v17 }
 0x218   :  { %v1382_v12 = vadd.f32 %v1381_v63, %v1358_v0 }
 0x219   :  { %v1403_v60 = vpop.f32.mrf.mxu3 }
 0x21a   :  { %v1404_v40 = vadd.f32 %v1403_v60, %v1382_v12 }
 0x21c   :  { %v1407_v27 = vadd.f32 %v1406_v5, %v1404_v40 }
 0x21e   :  { %1408 = vadd.xlane.f32.xlu0 %v1407_v27 }
 0x291   :  { %v1409_v55 = vpop.xlane.xlu0 %1408 }
 0x292   :  { %v4569_v57 = vmul.f32 0.001953125, %v1409_v55 }
 0x294   :  { %v1411_v15 = vmul.f32 %v4569_v57, %v4519_v62  ;;  %v1412_v58 = vmul.f32 %v4569_v57, %v4539_v9  ;;  %v1413_v19 = vmul.f32 %v4569_v57, %v4557_v52 }
 0x296   :  { %v1414_v37 = vsub.f32 %v4527_v28, %v1411_v15  ;;  %v1415_v43 = vsub.f32 %v4546_v41, %v1412_v58  ;;  %v1416_v49 = vsub.f32 %v963_v25, %v1413_v19 }
 0x298   :  { %v1417_v42 = vmul.f32 %v1414_v37, %v1414_v37  ;;  %v1418_v56 = vmul.f32 %v1415_v43, %v1415_v43  ;;  %v1419_v61 = vmul.f32 %v1416_v49, %v1416_v49 }
 0x29a   :  { %v1435_v29 = vand.u32 4294901760, %v1417_v42  ;;  %v1581_v14 = vand.u32 4294901760, %v1418_v56  ;;  %v1727_v1 = vand.u32 4294901760, %v1419_v61 }
 0x29c   :  { %1436 = vmatpush.msra.mxu0 %v1435_v29  ;;  %1512 = vmatpush.msra.mxu3 %v1435_v29  ;;  %v1462_v32 = vsub.f32 %v1417_v42, %v1435_v29  ;;  %v1608_v33 = vsub.f32 %v1418_v56, %v1581_v14  ;;  %v1754_v30 = vsub.f32 %v1419_v61, %v1727_v1  ;;  %v3883_v56 = vmov 0  }
 0x29d   :  { %1442 = vmatmul.f32.vlgmr.msra.gmra.mxu0 %v4529_v53  ;;  %1516 = vmatmul.f32.vlgmr.msra.gmra.mxu3 %v4516_v8 }
 0x29e   :  { %1489 = vmatpush.msra.mxu2 %v1462_v32  ;;  %v1463_v59 = vand.u32 4294901760, %v1462_v32  ;;  %v1609_v28 = vand.u32 4294901760, %v1608_v33  ;;  %v1755_v18 = vand.u32 4294901760, %v1754_v30  ;;  %3760 = vset.pattern.permute.xlu2 %v3883_v56 }
 0x29f   :  { %1492 = vmatmul.f32.vlgmr.msra.gmra.mxu2 %v4511_v4 }
 0x2a0   :  { %1582 = vmatpush.msrb.mxu2 %v1581_v14  ;;  %1538 = vmatpush.msrb.mxu0 %v1463_v59  ;;  %v1464_v41 = vsub.f32 %v1462_v32, %v1463_v59  ;;  %v1610_v25 = vsub.f32 %v1608_v33, %v1609_v28  ;;  %v1756_v50 = vsub.f32 %v1754_v30, %v1755_v18 }
 0x2a2   :  { %1684 = vmatpush.msra.mxu2 %v1609_v28  ;;  %1635 = vmatpush.msra.mxu0 %v1608_v33  ;;  %v1465_v10 = vand.u32 4294901760, %v1464_v41  ;;  %v1611_v20 = vand.u32 4294901760, %v1610_v25  ;;  %v1757_v48 = vand.u32 4294901760, %v1756_v50  ;;  %v60_v25 = vld [vmem:[#allocation8 + $0x18] sm:$0xff] }
 0x2a4   :  { %1466 = vmatpush.msra.mxu1 %v1465_v10  ;;  %1612 = vmatpush.msrb.mxu3 %v1611_v20 }
 0x2a5   :  { %1468 = vmatmul.f32.vlgmr.msra.gmra.mxu1 %v4508_v35  ;;  %1540 = vmatmul.f32.vlgmr.msrb.gmra.mxu0 %v4508_v35 }
 0x2a6   :  { %1560 = vmatpush.msrb.mxu1 %v1435_v29  ;;  %1706 = vmatpush.msra.mxu3 %v1581_v14 }
 0x2a7   :  { %1728 = vmatpush.msrb.mxu0 %v1727_v1  ;;  %1614 = vmatmul.f32.vlgmr.msrb.gmra.mxu3 %v4508_v35 }
 0x2a8   :  { %1658 = vmatpush.msra.mxu1 %v1581_v14  ;;  %1804 = vmatpush.msrb.mxu3 %v1727_v1 }
 0x2a9   :  { %1588 = vmatmul.f32.vlgmr.msrb.gmra.mxu2 %v4529_v53 }
 0x2aa   :  { %1781 = vmatpush.msrb.mxu2 %v1754_v30 }
 0x2ad   :  { %1562 = vmatmul.f32.vlgmr.msrb.gmra.mxu1 %v4508_v35  ;;  %1638 = vmatmul.f32.vlgmr.msra.gmra.mxu0 %v4511_v4 }
 0x2ae   :  { %1758 = vmatpush.msrb.mxu1 %v1757_v48  ;;  %1830 = vmatpush.msra.mxu0 %v1755_v18  ;;  %v3884_v18 = vmov 1  }
 0x2af   :  { %1708 = vmatmul.f32.vlgmr.msra.gmra.mxu3 %v4508_v35 }
 0x2b1   :  { %1686 = vmatmul.f32.vlgmr.msra.gmra.mxu2 %v4508_v35 }
 0x2b5   :  { %1662 = vmatmul.f32.vlgmr.msra.gmra.mxu1 %v4516_v8  ;;  %1734 = vmatmul.f32.vlgmr.msrb.gmra.mxu0 %v4529_v53 }
 0x2b6   :  { %1852 = vmatpush.msra.mxu1 %v1727_v1 }
 0x2b7   :  { %1808 = vmatmul.f32.vlgmr.msrb.gmra.mxu3 %v4516_v8 }
 0x2b9   :  { %1784 = vmatmul.f32.vlgmr.msrb.gmra.mxu2 %v4511_v4 }
 0x2bd   :  { %1760 = vmatmul.f32.vlgmr.msrb.gmra.mxu1 %v4508_v35  ;;  %1832 = vmatmul.f32.vlgmr.msra.gmra.mxu0 %v4508_v35 }
 0x2c5   :  { %1854 = vmatmul.f32.vlgmr.msra.gmra.mxu1 %v4508_v35 }
 0x31a   :  { %v1443_v31 = vpop.f32.mrf.mxu0 }
 0x320   :  { %v1517_v34 = vpop.f32.mrf.mxu3 }
 0x322   :  { %v1469_v47 = vpop.f32.mrf.mxu1  ;;  %v1493_v54 = vpop.f32.mrf.mxu2 }
 0x323   :  { %v1541_v7 = vpop.f32.mrf.mxu0  ;;  %v1470_v24 = vadd.f32 %v1469_v47, %v1443_v31 }
 0x325   :  { %v1494_v38 = vadd.f32 %v1493_v54, %v1470_v24 }
 0x327   :  { %v1518_v63 = vadd.f32 %v1517_v34, %v1494_v38 }
 0x329   :  { %v1542_v5 = vadd.f32 %v1541_v7, %v1518_v63 }
 0x32a   :  { %v1563_v3 = vpop.f32.mrf.mxu1  ;;  %v1615_v44 = vpop.f32.mrf.mxu3 }
 0x32b   :  { %v1639_v22 = vpop.f32.mrf.mxu0  ;;  %v1564_v58 = vadd.f32 %v1563_v3, %v1542_v5 }
 0x32c   :  { %v1589_v16 = vpop.f32.mrf.mxu2 }
 0x32d   :  { %v1616_v45 = vadd.f32 %v1615_v44, %v1589_v16 }
 0x32f   :  { %v1640_v21 = vadd.f32 %v1639_v22, %v1616_v45 }
 0x332   :  { %v1663_v51 = vpop.f32.mrf.mxu1  ;;  %v1709_v23 = vpop.f32.mrf.mxu3 }
 0x333   :  { %v1735_v26 = vpop.f32.mrf.mxu0  ;;  %v1664_v17 = vadd.f32 %v1663_v51, %v1640_v21 }
 0x334   :  { %v1687_v46 = vpop.f32.mrf.mxu2 }
 0x335   :  { %v1688_v0 = vadd.f32 %v1687_v46, %v1664_v17 }
 0x337   :  { %v1710_v55 = vadd.f32 %v1709_v23, %v1688_v0 }
 0x339   :  { %v1858_v43 = vadd.f32 %v1710_v55, %v1564_v58 }
 0x33a   :  { %v1761_v2 = vpop.f32.mrf.mxu1  ;;  %v1809_v60 = vpop.f32.mrf.mxu3 }
 0x33b   :  { %v1762_v39 = vadd.f32 %v1761_v2, %v1735_v26  ;;  %v1833_v27 = vpop.f32.mrf.mxu0 }
 0x33c   :  { %v1785_v12 = vpop.f32.mrf.mxu2 }
 0x33d   :  { %v1786_v40 = vadd.f32 %v1785_v12, %v1762_v39 }
 0x33f   :  { %v1810_v15 = vadd.f32 %v1809_v60, %v1786_v40 }
 0x341   :  { %v1834_v19 = vadd.f32 %v1833_v27, %v1810_v15 }
 0x342   :  { %v1855_v37 = vpop.f32.mrf.mxu1 }
 0x343   :  { %v1856_v49 = vadd.f32 %v1855_v37, %v1834_v19 }
 0x345   :  { %v1859_v42 = vadd.f32 %v1858_v43, %v1856_v49 }
 0x347   :  { %1860 = vadd.xlane.f32.xlu1 %v1859_v42 }
 0x3ba   :  { %v1861_v61 = vpop.xlane.xlu1 %1860 }
 0x3bb   :  { %v1862_v29 = vmul.f32 0.001953125, %v1861_v61 }
 0x3bd   :  { %v1863_v14 = vadd.f32 1e-05, %v1862_v29 }
 0x3bf   :  { %3765 = vrsqrt.f32 %v1863_v14  ;;  %vm1870_vm11 = vweird.f32 %v1863_v14 }
 0x3c5   :  { %v3766_v32 = vpop.eup %3765 }
 0x3c6   :  { %v1865_v33 = vmul.f32 %v3766_v32, %v1863_v14  ;;  %vm1871_vm10 = vweird.f32 %v3766_v32 }
 0x3c7   :  { %vm1872_vm12 = vmor %vm1870_vm11, %vm1871_vm10 }
 0x3c8   :  { %v1866_v1 = vmul.f32 %v3766_v32, %v1865_v33 }
 0x3ca   :  { %v1867_v59 = vmul.f32 0.5, %v1866_v1 }
 0x3cc   :  { %v1868_v28 = vsub.f32 1.5, %v1867_v59 }
 0x3ce   :  { %v1869_v41 = vmul.f32 %v3766_v32, %v1868_v28 }
 0x3d0   :  { %v1873_v30 = vsel %vm1872_vm12, %v3766_v32, %v1869_v41 }
 0x3d1   :  { %v1874_v10 = vmul.f32 %v1873_v30, %v60_v25  ;;  %v58_v30 = vld [vmem:[#allocation8 + $0x8] sm:$0xff] }
 0x3d3   :  { %v1883_v20 = vmul.f32 %v1874_v10, %v4569_v57 }
 0x3d5   :  { %1885 = vrot.lane.b32.xlu2 %v1883_v20, %s3878_s27 }
 0x3dd   :  { %1877 = vperm.xlu2 %3760, %v1874_v10  }
 0x3e5   :  { %3761 = vset.pattern.permute.xlu2 %v3884_v18 }
 0x42f   :  { %v1886_v50 = vpop.permute.xlu2 %1885 }
 0x430   :  { %v1888_v48 = vsub.f32 %v60_v25, %v1886_v50 }
 0x432   :  { %1891 = vperm.xlu2 %3761, %v1888_v48  }
 0x437   :  { %v1878_v31 = vpop.permute.xlu2 %1877 }
 0x438   :  { %v1880_v34 = vmul.f32 %v1878_v31, %v4523_v13  ;;  %v1881_v47 = vmul.f32 %v1878_v31, %v4541_v36  ;;  %v1882_v44 = vmul.f32 %v1878_v31, %v4559_v11 }
 0x48c   :  { %v1892_v54 = vpop.permute.xlu2 %1891 }
 0x48d   :  { %v1894_v7 = vadd.f32 %v1892_v54, %v1880_v34  ;;  %v1895_v3 = vadd.f32 %v1892_v54, %v1881_v47  ;;  %v1896_v22 = vadd.f32 %v1892_v54, %v1882_v44  ;;  %v2030_v34 = vsel %vm200_vm5, %v58_v30, 0 }
 0x48f   :  { %v1897_v16 = vmax.f32 %v1894_v7, 0.0  ;;  %v1898_v57 = vmax.f32 %v1895_v3, 0.0  ;;  %v1899_v13 = vmax.f32 %v1896_v22, 0.0  ;;  %v4773_v7 = vand.u32 4294901760, %v2030_v34 }
 0x491   :  { %v4603_v24 = vmul.f32 %v1897_v16, %v4519_v62  ;;  %v4606_v45 = vmul.f32 %v1898_v57, %v4539_v9  ;;  %v4615_v36 = vmul.f32 %v1899_v13, %v4557_v52 }
 0x493   :  { %1980 = vrot.lane.b32.xlu0 %v4606_v45, %s3876_s26  ;;  %1966 = vrot.lane.b32.xlu1 %v4603_v24, %s3875_s0  ;;  %v4708_v15 = vand.u32 4294901760, %v4603_v24 }
 0x494   :  { %1990 = vrot.lane.b32.xlu2 %v4603_v24, %s3877_s2 }
 0x495   :  { %v4730_v61 = vsub.f32 %v4603_v24, %v4708_v15 }
 0x497   :  { %v5298_v59 = vand.u32 4294901760, %v4730_v61 }
 0x499   :  { %v2100_v18 = vsub.f32 %v4730_v61, %v5298_v59 }
 0x49b   :  { %1956 = vrot.lane.b32.xlu0 %v4606_v45, %s3879_s28  ;;  %1943 = vrot.lane.b32.xlu1 %v4615_v36, %s3878_s27  ;;  %v2101_v54 = vand.u32 4294901760, %v2100_v18 }
 0x49c   :  { %1992 = vrot.lane.b32.xlu2 %v4606_v45, %s3877_s2 }
 0x4a3   :  { %1927 = vrot.lane.b32.xlu0 %v4603_v24, %s3880_s29  ;;  %1915 = vrot.lane.b32.xlu1 %v4603_v24, %s3881_s30 }
 0x4a4   :  { %1978 = vrot.lane.b32.xlu2 %v4603_v24, %s3876_s26 }
 0x4ab   :  { %1919 = vrot.lane.b32.xlu0 %v4615_v36, %s3881_s30  ;;  %1907 = vrot.lane.b32.xlu1 %v4615_v36, %s3882_s4 }
 0x4ac   :  { %1968 = vrot.lane.b32.xlu2 %v4606_v45, %s3875_s0 }
 0x4b3   :  { %1994 = vrot.lane.b32.xlu0 %v4615_v36, %s3877_s2  ;;  %1970 = vrot.lane.b32.xlu1 %v4615_v36, %s3875_s0 }
 0x4b4   :  { %1954 = vrot.lane.b32.xlu2 %v4603_v24, %s3879_s28 }
 0x4bb   :  { %1958 = vrot.lane.b32.xlu0 %v4615_v36, %s3879_s28  ;;  %1929 = vrot.lane.b32.xlu1 %v4606_v45, %s3880_s29 }
 0x4bc   :  { %1939 = vrot.lane.b32.xlu2 %v4603_v24, %s3878_s27 }
 0x4c3   :  { %1917 = vrot.lane.b32.xlu0 %v4606_v45, %s3881_s30 }
 0x4c4   :  { %1931 = vrot.lane.b32.xlu2 %v4615_v36, %s3880_s29 }
 0x4cc   :  { %1903 = vrot.lane.b32.xlu2 %v4603_v24, %s3882_s4 }
 0x4d4   :  { %1982 = vrot.lane.b32.xlu2 %v4615_v36, %s3876_s26 }
 0x4dc   :  { %1941 = vrot.lane.b32.xlu2 %v4606_v45, %s3878_s27 }
 0x4e4   :  { %1905 = vrot.lane.b32.xlu2 %v4606_v45, %s3882_s4 }
 0x4ee   :  { %v4659_v11 = vpop.permute.xlu2 %1990 }
 0x4f6   :  { %v4661_v51 = vpop.permute.xlu2 %1992 }
 0x4f7   :  { %v1997_v23 = vsel %vm166_vm2, %v4659_v11, %v4661_v51 }
 0x4f8   :  { %v4667_v46 = vand.u32 4294901760, %v1997_v23 }
 0x4fa   :  { %v4670_v26 = vsub.f32 %v1997_v23, %v4667_v46  ;;  %2040 = vmatpush.msra.mxu2 %v4667_v46  ;;  %2180 = vmatpush.msrb.mxu1 %v4667_v46 }
 0x4fc   :  { %v2075_v38 = vand.u32 4294901760, %v4670_v26  ;;  %2141 = vmatpush.msrb.mxu0 %v4670_v26 }
 0x4fe   :  { %v2076_v21 = vsub.f32 %v4670_v26, %v2075_v38  ;;  %v4679_v17 = vpop.permute.xlu2 %1978 }
 0x500   :  { %v2077_v63 = vand.u32 4294901760, %v2076_v21  ;;  %v4797_v21 = vsub.f32 %v2030_v34, %v4773_v7 }
 0x502   :  { %2078 = vmatpush.msra.mxu3 %v2077_v63 }
 0x505   :  { %v4681_v2 = vpop.permute.xlu0 %1980  ;;  %v4683_v0 = vpop.permute.xlu1 %1966 }
 0x506   :  { %v1985_v39 = vsel %vm153_vm1, %v4679_v17, %v4681_v2  ;;  %v4689_v12 = vpop.permute.xlu2 %1968 }
 0x507   :  { %v4691_v60 = vand.u32 4294901760, %v1985_v39  ;;  %v1973_v5 = vsel %vm140_vm0, %v4683_v0, %v4689_v12 }
 0x508   :  { %v4697_v40 = vand.u32 4294901760, %v1973_v5 }
 0x509   :  { %v4700_v27 = vsub.f32 %v1985_v39, %v4691_v60  ;;  %2042 = vmatpush.msra.mxu2 %v4691_v60  ;;  %2182 = vmatpush.msrb.mxu1 %v4691_v60 }
 0x50a   :  { %v4705_v55 = vsub.f32 %v1973_v5, %v4697_v40 }
 0x50b   :  { %2044 = vmatpush.msra.mxu2 %v4697_v40  ;;  %2144 = vmatpush.msrb.mxu0 %v4700_v27  ;;  %v2081_v58 = vand.u32 4294901760, %v4700_v27 }
 0x50c   :  { %2184 = vmatpush.msrb.mxu1 %v4697_v40  ;;  %v2087_v19 = vand.u32 4294901760, %v4705_v55 }
 0x50d   :  { %v4715_v37 = vpop.permute.xlu0 %1956  ;;  %v4717_v43 = vpop.permute.xlu1 %1943  ;;  %2147 = vmatpush.msrb.mxu0 %v4705_v55  ;;  %v2082_v49 = vsub.f32 %v4700_v27, %v2081_v58 }
 0x50e   :  { %v4723_v42 = vpop.permute.xlu2 %1954  ;;  %v2088_v56 = vsub.f32 %v4705_v55, %v2087_v19 }
 0x50f   :  { %v1961_v29 = vsel %vm127_vm3, %v4723_v42, %v4715_v37  ;;  %v2083_v14 = vand.u32 4294901760, %v2082_v49 }
 0x510   :  { %v4736_v32 = vand.u32 4294901760, %v1961_v29  ;;  %v2089_v33 = vand.u32 4294901760, %v2088_v56 }
 0x511   :  { %2084 = vmatpush.msra.mxu3 %v2083_v14  ;;  %v4814_v14 = vand.u32 4294901760, %v4797_v21 }
 0x512   :  { %v4739_v1 = vsub.f32 %v1961_v29, %v4736_v32  ;;  %2046 = vmatpush.msra.mxu2 %v4736_v32  ;;  %2186 = vmatpush.msrb.mxu1 %v4736_v32 }
 0x513   :  { %2090 = vmatpush.msra.mxu3 %v2089_v33 }
 0x514   :  { %2048 = vmatpush.msra.mxu2 %v4708_v15  ;;  %2150 = vmatpush.msrb.mxu0 %v4739_v1  ;;  %v5300_v28 = vand.u32 4294901760, %v4739_v1  ;;  %v5307_v52 = vand.u32 4294901760, %v4739_v1 }
 0x515   :  { %2188 = vmatpush.msrb.mxu1 %v4708_v15  ;;  %v4748_v41 = vpop.permute.xlu0 %1927  ;;  %v4750_v25 = vpop.permute.xlu1 %1915 }
 0x516   :  { %v4752_v10 = vpop.permute.xlu2 %1939  ;;  %2153 = vmatpush.msrb.mxu0 %v4730_v61  ;;  %v2094_v20 = vsub.f32 %v4739_v1, %v5300_v28 }
 0x517   :  { %v1947_v50 = vsel %vm111_vm6, %v4717_v43, %v4752_v10 }
 0x518   :  { %v4765_v48 = vand.u32 4294901760, %v1947_v50  ;;  %v2095_v31 = vand.u32 4294901760, %v2094_v20 }
 0x51a   :  { %v4769_v47 = vsub.f32 %v1947_v50, %v4765_v48  ;;  %2050 = vmatpush.msra.mxu2 %v4765_v48  ;;  %2096 = vmatpush.msra.mxu3 %v2095_v31 }
 0x51b   :  { %2190 = vmatpush.msrb.mxu1 %v4765_v48 }
 0x51c   :  { %2102 = vmatpush.msra.mxu3 %v2101_v54  ;;  %2156 = vmatpush.msrb.mxu0 %v4769_v47  ;;  %v5296_v3 = vand.u32 4294901760, %v4769_v47 }
 0x51d   :  { %v4777_v44 = vpop.permute.xlu0 %1919  ;;  %v4779_v16 = vpop.permute.xlu1 %1907 }
 0x51e   :  { %v1923_v57 = vsel %vm85_vm7, %v4777_v44, %v4750_v25  ;;  %v4785_v22 = vpop.permute.xlu2 %1931  ;;  %v2106_v24 = vsub.f32 %v4769_v47, %v5296_v3 }
 0x51f   :  { %v4790_v13 = vand.u32 4294901760, %v1923_v57  ;;  %v1935_v23 = vsel %vm98_vm4, %v4785_v22, %v4748_v41 }
 0x520   :  { %v4799_v63 = vand.u32 4294901760, %v1935_v23  ;;  %v2107_v39 = vand.u32 4294901760, %v2106_v24 }
 0x521   :  { %v4802_v5 = vsub.f32 %v1923_v57, %v4790_v13 }
 0x522   :  { %v4805_v49 = vsub.f32 %v1935_v23, %v4799_v63  ;;  %2052 = vmatpush.msra.mxu2 %v4799_v63  ;;  %2108 = vmatpush.msra.mxu3 %v2107_v39 }
 0x523   :  { %2192 = vmatpush.msrb.mxu1 %v4799_v63  ;;  %v5297_v29 = vand.u32 4294901760, %v4802_v5 }
 0x524   :  { %2054 = vmatpush.msra.mxu2 %v4790_v13  ;;  %2159 = vmatpush.msrb.mxu0 %v4805_v49  ;;  %v5295_v56 = vand.u32 4294901760, %v4805_v49 }
 0x525   :  { %2194 = vmatpush.msrb.mxu1 %v4790_v13  ;;  %v4817_v33 = vpop.permute.xlu0 %1994  ;;  %v4819_v30 = vpop.permute.xlu1 %1970  ;;  %v2118_v54 = vsub.f32 %v4802_v5, %v5297_v29 }
 0x526   :  { %v1996_v20 = vsel %vm166_vm2, %v4661_v51, %v4817_v33  ;;  %v4825_v18 = vpop.permute.xlu2 %1903  ;;  %2162 = vmatpush.msrb.mxu0 %v4802_v5  ;;  %v2112_v34 = vsub.f32 %v4805_v49, %v5295_v56  ;;  %v2060_v51 = vsub.f32 %v4797_v21, %v4814_v14  ;;  %v1972_v24 = vsel %vm140_vm0, %v4689_v12, %v4819_v30 }
 0x527   :  { %v4828_v50 = vand.u32 4294901760, %v1996_v20  ;;  %v1911_v31 = vsel %vm72_vm8, %v4779_v16, %v4825_v18  ;;  %v4852_v3 = vand.u32 4294901760, %v1972_v24 }
 0x528   :  { %v4849_v23 = vand.u32 4294901760, %v1911_v31  ;;  %v2113_v39 = vand.u32 4294901760, %v2112_v34  ;;  %v4858_v59 = vand.u32 4294901760, %v2060_v51 }
 0x529   :  { %v4843_v57 = vsub.f32 %v1996_v20, %v4828_v50  ;;  %v2119_v20 = vand.u32 4294901760, %v2118_v54 }
 0x52a   :  { %v4855_v29 = vsub.f32 %v1911_v31, %v4849_v23  ;;  %2056 = vmatpush.msra.mxu2 %v4849_v23  ;;  %2114 = vmatpush.msra.mxu3 %v2113_v39  ;;  %v4884_v39 = vsub.f32 %v1972_v24, %v4852_v3 }
 0x52b   :  { %v5299_v56 = vand.u32 4294901760, %v4843_v57  ;;  %2196 = vmatpush.msrb.mxu1 %v4849_v23  ;;  %2062 = vmatmul.f32.vlgmr.msra.gmra.mxu2 %v4858_v59 }
 0x52c   :  { %2214 = vmatpush.msrb.mxu2 %v2075_v38  ;;  %2120 = vmatpush.msra.mxu3 %v2119_v20  ;;  %v2123_v51 = vand.u32 4294901760, %v4855_v29  ;;  %v5303_v55 = vand.u32 4294901760, %v4884_v39 }
 0x52d   :  { %v4863_v12 = vpop.permute.xlu0 %1958  ;;  %v2326_v34 = vsub.f32 %v4843_v57, %v5299_v56  ;;  %2165 = vmatpush.msrb.mxu0 %v4855_v29  ;;  %v4881_v38 = vpop.permute.xlu1 %1929  ;;  %v4892_v56 = vand.u32 4294901760, %v4606_v45  ;;  %2200 = vmatmul.f32.vlgmr.msrb.gmra.mxu1 %v4814_v14 }
 0x52e   :  { %v1960_v31 = vsel %vm127_vm3, %v4715_v37, %v4863_v12  ;;  %v4873_v54 = vpop.permute.xlu2 %1982  ;;  %2218 = vmatpush.msrb.mxu2 %v2081_v58  ;;  %v2124_v20 = vsub.f32 %v4855_v29, %v2123_v51  ;;  %2168 = vmatmul.f32.vlgmr.msrb.gmra.mxu0 %v4797_v21 }
 0x52f   :  { %2290 = vmatpush.msra.mxu0 %v4828_v50  ;;  %v4879_v26 = vand.u32 4294901760, %v1960_v31  ;;  %v1984_v37 = vsel %vm153_vm1, %v4681_v2, %v4873_v54  ;;  %v1934_v2 = vsel %vm98_vm4, %v4748_v41, %v4881_v38  ;;  %v2327_v24 = vand.u32 4294901760, %v2326_v34 }
 0x530   :  { %v4896_v27 = vand.u32 4294901760, %v1984_v37  ;;  %2222 = vmatpush.msrb.mxu2 %v2087_v19  ;;  %v2125_v29 = vand.u32 4294901760, %v2124_v20  ;;  %v4917_v19 = vsub.f32 %v4606_v45, %v4892_v56  ;;  %v5308_v41 = vand.u32 4294901760, %v4730_v61 }
 0x531   :  { %v4902_v58 = vsub.f32 %v1960_v31, %v4879_v26  ;;  %2328 = vmatpush.msra.mxu1 %v2327_v24  ;;  %v4919_v31 = vand.u32 4294901760, %v1934_v2 }
 0x532   :  { %v4909_v28 = vsub.f32 %v1984_v37, %v4896_v27  ;;  %2226 = vmatpush.msrb.mxu2 %v5307_v52  ;;  %2292 = vmatpush.msra.mxu0 %v4896_v27  ;;  %v5309_v37 = vand.u32 4294901760, %v4769_v47  ;;  %v2338_v47 = vsub.f32 %v4884_v39, %v5303_v55 }
 0x533   :  { %2126 = vmatpush.msra.mxu3 %v2125_v29  ;;  %v2343_v61 = vand.u32 4294901760, %v4902_v58  ;;  %v4956_v24 = vsub.f32 %v1934_v2, %v4919_v31  ;;  %v5311_v2 = vand.u32 4294901760, %v4802_v5 }
 0x534   :  { %2230 = vmatpush.msrb.mxu2 %v5308_v41  ;;  %v5304_v52 = vand.u32 4294901760, %v4909_v28  ;;  %2294 = vmatpush.msra.mxu0 %v4852_v3  ;;  %v5310_v41 = vand.u32 4294901760, %v4805_v49 }
 0x535   :  { %2260 = vmatpush.msrb.mxu3 %v4667_v46  ;;  %v4924_v34 = vpop.permute.xlu0 %1917  ;;  %v2344_v55 = vsub.f32 %v4902_v58, %v2343_v61 }
 0x536   :  { %v1922_v1 = vsel %vm85_vm7, %v4750_v25, %v4924_v34  ;;  %v4932_v45 = vpop.permute.xlu2 %1941  ;;  %2128 = vmatmul.f32.vlgmr.msra.gmra.mxu3 %v4773_v7  ;;  %2234 = vmatpush.msrb.mxu2 %v5309_v37  ;;  %v2332_v25 = vsub.f32 %v4909_v28, %v5304_v52 }
 0x537   :  { %2262 = vmatpush.msrb.mxu3 %v4691_v60  ;;  %v4939_v46 = vand.u32 4294901760, %v1922_v1  ;;  %v1946_v20 = vsel %vm111_vm6, %v4752_v10, %v4932_v45  ;;  %2296 = vmatpush.msra.mxu0 %v4879_v26  ;;  %v2349_v60 = vand.u32 4294901760, %v4917_v19 }
 0x538   :  { %v4945_v29 = vand.u32 4294901760, %v1946_v20  ;;  %2238 = vmatpush.msrb.mxu2 %v5310_v41  ;;  %v2333_v37 = vand.u32 4294901760, %v2332_v25 }
 0x539   :  { %2264 = vmatpush.msrb.mxu3 %v4697_v40  ;;  %2298 = vmatpush.msra.mxu0 %v4892_v56  ;;  %v4969_v52 = vsub.f32 %v1922_v1, %v4939_v46  ;;  %v2339_v40 = vand.u32 4294901760, %v2338_v47  ;;  %v2350_v49 = vsub.f32 %v4917_v19, %v2349_v60  ;;  %v2361_v1 = vand.u32 4294901760, %v4956_v24 }
 0x53a   :  { %v4962_v10 = vsub.f32 %v1946_v20, %v4945_v29  ;;  %2242 = vmatpush.msrb.mxu2 %v5311_v2  ;;  %2334 = vmatpush.msra.mxu1 %v2333_v37 }
 0x53b   :  { %2266 = vmatpush.msrb.mxu3 %v4736_v32  ;;  %2300 = vmatpush.msra.mxu0 %v4945_v29  ;;  %v2345_v32 = vand.u32 4294901760, %v2344_v55  ;;  %v2351_v55 = vand.u32 4294901760, %v2350_v49 }
 0x53c   :  { %v2355_v20 = vand.u32 4294901760, %v4962_v10  ;;  %2246 = vmatpush.msrb.mxu2 %v2123_v51  ;;  %2340 = vmatpush.msra.mxu1 %v2339_v40  ;;  %v2367_v51 = vand.u32 4294901760, %v4969_v52  ;;  %v1998_v40 = vsel %vm166_vm2, %v4817_v33, %v4659_v11  ;;  %v5313_v11 = vand.u32 4294901760, %v4909_v28 }
 0x53d   :  { %2268 = vmatpush.msrb.mxu3 %v4708_v15  ;;  %2302 = vmatpush.msra.mxu0 %v4919_v31 }
 0x53e   :  { %v4982_v5 = vpop.permute.xlu2 %1905  ;;  %v2356_v25 = vsub.f32 %v4962_v10, %v2355_v20  ;;  %2391 = vmatpush.msra.mxu2 %v4843_v57  ;;  %2346 = vmatpush.msra.mxu1 %v2345_v32 }
 0x53f   :  { %2270 = vmatpush.msrb.mxu3 %v4765_v48  ;;  %v1910_v15 = vsel %vm72_vm8, %v4825_v18, %v4982_v5  ;;  %2304 = vmatpush.msra.mxu0 %v4939_v46  ;;  %v2362_v48 = vsub.f32 %v4956_v24, %v2361_v1  ;;  %v2368_v18 = vsub.f32 %v4969_v52, %v2367_v51 }
 0x540   :  { %v4994_v47 = vand.u32 4294901760, %v1910_v15  ;;  %v2357_v41 = vand.u32 4294901760, %v2356_v25  ;;  %2394 = vmatpush.msra.mxu2 %v4909_v28  ;;  %2352 = vmatpush.msra.mxu1 %v2351_v55  ;;  %v1974_v25 = vsel %vm140_vm0, %v4819_v30, %v4683_v0  ;;  %v1962_v28 = vsel %vm127_vm3, %v4863_v12, %v4723_v42 }
 0x541   :  { %2272 = vmatpush.msrb.mxu3 %v4799_v63  ;;  %2248 = vmatmul.f32.vlgmr.msrb.gmra.mxu2 %v4773_v7  ;;  %v2363_v2 = vand.u32 4294901760, %v2362_v48  ;;  %v2369_v32 = vand.u32 4294901760, %v2368_v18  ;;  %v5056_v30 = vand.u32 4294901760, %v1974_v25  ;;  %v5063_v42 = vand.u32 4294901760, %v1962_v28 }
 0x542   :  { %v5003_v37 = vsub.f32 %v1910_v15, %v4994_v47  ;;  %2397 = vmatpush.msra.mxu2 %v4884_v39  ;;  %2306 = vmatpush.msra.mxu0 %v4994_v47 }
 0x543   :  { %2274 = vmatpush.msrb.mxu3 %v4790_v13  ;;  %2358 = vmatpush.msra.mxu1 %v2357_v41  ;;  %v5312_v13 = vand.u32 4294901760, %v4843_v57  ;;  %v5033_v57 = vand.u32 4294901760, %v1998_v40 }
 0x544   :  { %v2373_v63 = vand.u32 4294901760, %v5003_v37  ;;  %2400 = vmatpush.msra.mxu2 %v4902_v58  ;;  %v1945_v58 = vsel %vm111_vm6, %v4932_v45, %v4717_v43  ;;  %v1933_v43 = vsel %vm98_vm4, %v4881_v38, %v4785_v22  ;;  %v1921_v22 = vsel %vm85_vm7, %v4924_v34, %v4777_v44  ;;  %2312 = vmatmul.f32.vlgmr.msra.gmra.mxu0 %v4858_v59 }
 0x545   :  { %2276 = vmatpush.msrb.mxu3 %v4849_v23  ;;  %2464 = vmatpush.msrb.mxu0 %v5312_v13  ;;  %v1986_v23 = vsel %vm153_vm1, %v4873_v54, %v4679_v17  ;;  %v5314_v17 = vand.u32 4294901760, %v4884_v39  ;;  %v5054_v0 = vsub.f32 %v1998_v40, %v5033_v57  ;;  %v5075_v39 = vsub.f32 %v1974_v25, %v5056_v30 }
 0x546   :  { %2278 = vmatmul.f32.vlgmr.msrb.gmra.mxu3 %v4773_v7  ;;  %v2374_v49 = vsub.f32 %v5003_v37, %v2373_v63  ;;  %2364 = vmatpush.msra.mxu1 %v2363_v2  ;;  %v5043_v54 = vand.u32 4294901760, %v1986_v23  ;;  %v5099_v45 = vand.u32 4294901760, %v1945_v58  ;;  %v5114_v38 = vand.u32 4294901760, %v1933_v43 }
 0x547   :  { %2403 = vmatpush.msra.mxu2 %v4917_v19  ;;  %2430 = vmatpush.msra.mxu3 %v4828_v50  ;;  %v5090_v19 = vsub.f32 %v1962_v28, %v5063_v42  ;;  %v1909_v44 = vsel %vm72_vm8, %v4982_v5, %v4779_v16 }
 0x548   :  { %2468 = vmatpush.msrb.mxu0 %v5313_v11  ;;  %v2375_v33 = vand.u32 4294901760, %v2374_v49  ;;  %2370 = vmatpush.msra.mxu1 %v2369_v32  ;;  %v5066_v12 = vsub.f32 %v1986_v23, %v5043_v54 }
 0x549   :  { %2406 = vmatpush.msra.mxu2 %v4962_v10  ;;  %2432 = vmatpush.msra.mxu3 %v4896_v27  ;;  %v2593_v34 = vand.u32 4294901760, %v5090_v19  ;;  %v5148_v10 = vand.u32 4294901760, %v1909_v44 }
 0x54a   :  { %2472 = vmatpush.msrb.mxu0 %v5314_v17  ;;  %2376 = vmatpush.msra.mxu1 %v2375_v33 }
 0x54b   :  { %2409 = vmatpush.msra.mxu2 %v4956_v24  ;;  %2434 = vmatpush.msra.mxu3 %v4852_v3  ;;  %v5146_v24 = vsub.f32 %v1933_v43, %v5114_v38  ;;  %v2594_v5 = vsub.f32 %v5090_v19, %v2593_v34  ;;  %v2622_v55 = vsub.f32 %v1909_v44, %v5148_v10 }
 0x54c   :  { %2476 = vmatpush.msrb.mxu0 %v2343_v61  ;;  %2510 = vmatpush.msrb.mxu1 %v4828_v50  ;;  %v2575_v50 = vand.u32 4294901760, %v5054_v0 }
 0x54d   :  { %2412 = vmatpush.msra.mxu2 %v4969_v52  ;;  %2436 = vmatpush.msra.mxu3 %v4879_v26  ;;  %v2611_v48 = vand.u32 4294901760, %v5146_v24  ;;  %v2623_v2 = vand.u32 4294901760, %v2622_v55 }
 0x54e   :  { %2480 = vmatpush.msrb.mxu0 %v2349_v60  ;;  %2512 = vmatpush.msrb.mxu1 %v4896_v27  ;;  %v5087_v27 = vand.u32 4294901760, %v4615_v36  ;;  %v2576_v61 = vsub.f32 %v5054_v0, %v2575_v50  ;;  %v5133_v60 = vand.u32 4294901760, %v1921_v22 }
 0x54f   :  { %2415 = vmatpush.msra.mxu2 %v5003_v37  ;;  %2438 = vmatpush.msra.mxu3 %v4892_v56  ;;  %v2595_v37 = vand.u32 4294901760, %v2594_v5  ;;  %v2624_v49 = vsub.f32 %v2622_v55, %v2623_v2 }
 0x550   :  { %2484 = vmatpush.msrb.mxu0 %v2355_v20  ;;  %2514 = vmatpush.msrb.mxu1 %v4852_v3  ;;  %v2581_v3 = vand.u32 4294901760, %v5066_v12  ;;  %v5120_v52 = vsub.f32 %v4615_v36, %v5087_v27  ;;  %v5136_v36 = vsub.f32 %v1945_v58, %v5099_v45  ;;  %v2577_v6 = vand.u32 4294901760, %v2576_v61 }
 0x551   :  { %2540 = vmatpush.msrb.mxu2 %v5033_v57  ;;  %2440 = vmatpush.msra.mxu3 %v4945_v29  ;;  %v5158_v15 = vsub.f32 %v1921_v22, %v5133_v60  ;;  %v2625_v23 = vand.u32 4294901760, %v2624_v49 }
 0x552   :  { %2488 = vmatpush.msrb.mxu0 %v2361_v1  ;;  %2516 = vmatpush.msrb.mxu1 %v4879_v26  ;;  %v2587_v26 = vand.u32 4294901760, %v5075_v39  ;;  %v2599_v20 = vand.u32 4294901760, %v5120_v52 }
 0x553   :  { %2542 = vmatpush.msrb.mxu2 %v5043_v54  ;;  %2442 = vmatpush.msra.mxu3 %v4919_v31  ;;  %v2617_v18 = vand.u32 4294901760, %v5158_v15 }
 0x554   :  { %2492 = vmatpush.msrb.mxu0 %v2367_v51  ;;  %2518 = vmatpush.msrb.mxu1 %v4892_v56  ;;  %v2582_v56 = vsub.f32 %v5066_v12, %v2581_v3  ;;  %v2588_v16 = vsub.f32 %v5075_v39, %v2587_v26  ;;  %v2600_v41 = vsub.f32 %v5120_v52, %v2599_v20 }
 0x555   :  { %2544 = vmatpush.msrb.mxu2 %v5056_v30  ;;  %2444 = vmatpush.msra.mxu3 %v4939_v46  ;;  %v2618_v13 = vsub.f32 %v5158_v15, %v2617_v18 }
 0x556   :  { %2418 = vmatmul.f32.vlgmr.msra.gmra.mxu2 %v4797_v21  ;;  %2496 = vmatpush.msrb.mxu0 %v2373_v63  ;;  %v2583_v1 = vand.u32 4294901760, %v2582_v56  ;;  %v2589_v51 = vand.u32 4294901760, %v2588_v16  ;;  %v2601_v63 = vand.u32 4294901760, %v2600_v41 }
 0x557   :  { %2546 = vmatpush.msrb.mxu2 %v5063_v42  ;;  %2446 = vmatpush.msra.mxu3 %v4994_v47  ;;  %v2619_v32 = vand.u32 4294901760, %v2618_v13 }
 0x558   :  { %2641 = vmatpush.msra.mxu0 %v5054_v0  ;;  %2450 = vmatmul.f32.vlgmr.msra.gmra.mxu3 %v4814_v14 }
 0x559   :  { %2520 = vmatpush.msrb.mxu1 %v4945_v29  ;;  %2548 = vmatpush.msrb.mxu2 %v5087_v27  ;;  %v2605_v29 = vand.u32 4294901760, %v5136_v36 }
 0x55a   :  { %2578 = vmatpush.msrb.mxu3 %v2577_v6  ;;  %2644 = vmatpush.msra.mxu0 %v5066_v12 }
 0x55b   :  { %2378 = vmatmul.f32.vlgmr.msra.gmra.mxu1 %v4773_v7  ;;  %2550 = vmatpush.msrb.mxu2 %v5099_v45 }
 0x55c   :  { %2522 = vmatpush.msrb.mxu1 %v4919_v31  ;;  %2584 = vmatpush.msrb.mxu3 %v2583_v1  ;;  %v2606_v31 = vsub.f32 %v5136_v36, %v2605_v29 }
 0x55d   :  { %2647 = vmatpush.msra.mxu0 %v5075_v39  ;;  %2552 = vmatpush.msrb.mxu2 %v5114_v38 }
 0x55e   :  { %2524 = vmatpush.msrb.mxu1 %v4939_v46  ;;  %2590 = vmatpush.msrb.mxu3 %v2589_v51  ;;  %v2612_v46 = vsub.f32 %v5146_v24, %v2611_v48  ;;  %v2607_v40 = vand.u32 4294901760, %v2606_v31 }
 0x55f   :  { %2650 = vmatpush.msra.mxu0 %v5090_v19  ;;  %2554 = vmatpush.msrb.mxu2 %v5133_v60 }
 0x560   :  { %2526 = vmatpush.msrb.mxu1 %v4994_v47  ;;  %2596 = vmatpush.msrb.mxu3 %v2595_v37  ;;  %v2613_v47 = vand.u32 4294901760, %v2612_v46 }
 0x561   :  { %2653 = vmatpush.msra.mxu0 %v5120_v52  ;;  %2556 = vmatpush.msrb.mxu2 %v5148_v10 }
 0x562   :  { %2680 = vmatpush.msra.mxu1 %v5033_v57  ;;  %2498 = vmatmul.f32.vlgmr.msrb.gmra.mxu0 %v4773_v7 }
 0x563   :  { %2602 = vmatpush.msrb.mxu3 %v2601_v63  ;;  %2656 = vmatpush.msra.mxu0 %v5136_v36 }
 0x564   :  { %2682 = vmatpush.msra.mxu1 %v5043_v54  ;;  %2714 = vmatpush.msra.mxu2 %v2575_v50 }
 0x565   :  { %2528 = vmatmul.f32.vlgmr.msrb.gmra.mxu1 %v4773_v7  ;;  %2608 = vmatpush.msrb.mxu3 %v2607_v40 }
 0x566   :  { %2659 = vmatpush.msra.mxu0 %v5146_v24  ;;  %2684 = vmatpush.msra.mxu1 %v5056_v30 }
 0x567   :  { %2718 = vmatpush.msra.mxu2 %v2581_v3  ;;  %2614 = vmatpush.msrb.mxu3 %v2613_v47 }
 0x568   :  { %2662 = vmatpush.msra.mxu0 %v5158_v15  ;;  %2686 = vmatpush.msra.mxu1 %v5063_v42 }
 0x569   :  { %2722 = vmatpush.msra.mxu2 %v2587_v26  ;;  %2620 = vmatpush.msrb.mxu3 %v2619_v32 }
 0x56a   :  { %2665 = vmatpush.msra.mxu0 %v2622_v55  ;;  %2688 = vmatpush.msra.mxu1 %v5087_v27 }
 0x56b   :  { %2726 = vmatpush.msra.mxu2 %v2593_v34  ;;  %2626 = vmatpush.msrb.mxu3 %v2625_v23 }
 0x56c   :  { %2690 = vmatpush.msra.mxu1 %v5099_v45  ;;  %2628 = vmatmul.f32.vlgmr.msrb.gmra.mxu3 %v4773_v7 }
 0x56d   :  { %2760 = vmatpush.msra.mxu3 %v5033_v57  ;;  %2730 = vmatpush.msra.mxu2 %v2599_v20 }
 0x56e   :  { %2692 = vmatpush.msra.mxu1 %v5114_v38  ;;  %2668 = vmatmul.f32.vlgmr.msra.gmra.mxu0 %v4797_v21 }
 0x56f   :  { %2762 = vmatpush.msra.mxu3 %v5043_v54  ;;  %2734 = vmatpush.msra.mxu2 %v2605_v29 }
 0x570   :  { %2694 = vmatpush.msra.mxu1 %v5133_v60  ;;  %2562 = vmatmul.f32.vlgmr.msrb.gmra.mxu2 %v4858_v59 }
 0x571   :  { %2764 = vmatpush.msra.mxu3 %v5056_v30  ;;  %2738 = vmatpush.msra.mxu2 %v2611_v48  ;;  %v5315_v48 = vld [vmem:[#allocation13_spill] sm:$0xff] }
 0x572   :  { %2696 = vmatpush.msra.mxu1 %v5148_v10 }
 0x573   :  { %2742 = vmatpush.msra.mxu2 %v2617_v18  ;;  %2766 = vmatpush.msra.mxu3 %v5063_v42 }
 0x574   :  { %2700 = vmatmul.f32.vlgmr.msra.gmra.mxu1 %v4814_v14 }
 0x575   :  { %2746 = vmatpush.msra.mxu2 %v2623_v2  ;;  %2768 = vmatpush.msra.mxu3 %v5087_v27 }
 0x577   :  { %2770 = vmatpush.msra.mxu3 %v5099_v45 }
 0x578   :  { %2748 = vmatmul.f32.vlgmr.msra.gmra.mxu2 %v4773_v7 }
 0x579   :  { %2772 = vmatpush.msra.mxu3 %v5114_v38 }
 0x57b   :  { %2774 = vmatpush.msra.mxu3 %v5133_v60 }
 0x57d   :  { %2776 = vmatpush.msra.mxu3 %v5148_v10 }
 0x57e   :  { %2778 = vmatmul.f32.vlgmr.msra.gmra.mxu3 %v4773_v7 }
 0x5aa   :  { %v2201_v57 = vpop.f32.mrf.mxu1 }
 0x5ab   :  { %v2169_v33 = vpop.f32.mrf.mxu0 }
 0x5ae   :  { %v2063_v59 = vpop.f32.mrf.mxu2 }
 0x5b9   :  { %v2129_v21 = vpop.f32.mrf.mxu3 }
 0x5ba   :  { %v2130_v11 = vadd.f32 %v2129_v21, %v2063_v59 }
 0x5bc   :  { %v2170_v14 = vadd.f32 %v2169_v33, %v2130_v11 }
 0x5be   :  { %v2202_v25 = vadd.f32 %v2201_v57, %v2170_v14 }
 0x5c1   :  { %v2313_v39 = vpop.f32.mrf.mxu0 }
 0x5c4   :  { %v2249_v17 = vpop.f32.mrf.mxu2 }
 0x5c5   :  { %v2250_v54 = vadd.f32 %v2249_v17, %v2202_v25 }
 0x5c9   :  { %v2279_v28 = vpop.f32.mrf.mxu3 }
 0x5ca   :  { %v5216_v0 = vadd.f32 %v2279_v28, %v2250_v54 }
 0x5cc   :  { %v5220_v30 = vmul.f32 %v5216_v0, %v4519_v62 }
 0x5ce   :  { %v2800_v42 = vand.u32 4294901760, %v5220_v30 }
 0x5d0   :  { %v2827_v7 = vsub.f32 %v5220_v30, %v2800_v42  ;;  %2801 = vmatpush.msrb.mxu0 %v2800_v42 }
 0x5d1   :  { %2807 = vmatmul.f32.vlgmr.msrb.gmra.mxu0 %v4529_v53 }
 0x5d2   :  { %2854 = vmatpush.msra.mxu0 %v2827_v7  ;;  %v2828_v12 = vand.u32 4294901760, %v2827_v7 }
 0x5d4   :  { %v2829_v50 = vsub.f32 %v2827_v7, %v2828_v12  ;;  %2903 = vmatpush.msrb.mxu0 %v2828_v12 }
 0x5d6   :  { %v2830_v58 = vand.u32 4294901760, %v2829_v50 }
 0x5d8   :  { %2831 = vmatpush.msrb.mxu1 %v2830_v58  ;;  %v2379_v27 = vpop.f32.mrf.mxu1 }
 0x5d9   :  { %v2419_v19 = vpop.f32.mrf.mxu2  ;;  %2857 = vmatmul.f32.vlgmr.msra.gmra.mxu0 %v4511_v4  ;;  %v2380_v43 = vadd.f32 %v2379_v27, %v2313_v39  ;;  %2833 = vmatmul.f32.vlgmr.msrb.gmra.mxu1 %v4508_v35 }
 0x5da   :  { %2877 = vmatpush.msra.mxu1 %v2800_v42 }
 0x5db   :  { %v2420_v3 = vadd.f32 %v2419_v19, %v2380_v43  ;;  %v2451_v45 = vpop.f32.mrf.mxu3 }
 0x5dc   :  { %2925 = vmatpush.msrb.mxu1 %v2800_v42 }
 0x5dd   :  { %v2452_v61 = vadd.f32 %v2451_v45, %v2420_v3 }
 0x5df   :  { %v2499_v22 = vpop.f32.mrf.mxu0 }
 0x5e0   :  { %v2500_v26 = vadd.f32 %v2499_v22, %v2452_v61 }
 0x5e1   :  { %2905 = vmatmul.f32.vlgmr.msrb.gmra.mxu0 %v4508_v35  ;;  %2881 = vmatmul.f32.vlgmr.msra.gmra.mxu1 %v4516_v8 }
 0x5e2   :  { %v2529_v38 = vpop.f32.mrf.mxu1 }
 0x5e3   :  { %v5229_v52 = vadd.f32 %v2529_v38, %v2500_v26 }
 0x5e5   :  { %v5233_v44 = vmul.f32 %v5229_v52, %v4539_v9 }
 0x5e7   :  { %v2946_v56 = vand.u32 4294901760, %v5233_v44 }
 0x5e9   :  { %v2973_v34 = vsub.f32 %v5233_v44, %v2946_v56  ;;  %2947 = vmatpush.msrb.mxu2 %v2946_v56  ;;  %3023 = vmatpush.msra.mxu1 %v2946_v56 }
 0x5ea   :  { %2953 = vmatmul.f32.vlgmr.msrb.gmra.mxu2 %v4529_v53  ;;  %2927 = vmatmul.f32.vlgmr.msrb.gmra.mxu1 %v4508_v35 }
 0x5eb   :  { %v2974_v60 = vand.u32 4294901760, %v2973_v34  ;;  %3000 = vmatpush.msra.mxu0 %v2973_v34  ;;  %v2669_v10 = vpop.f32.mrf.mxu0 }
 0x5ec   :  { %3003 = vmatmul.f32.vlgmr.msra.gmra.mxu0 %v4511_v4 }
 0x5ed   :  { %v2975_v36 = vsub.f32 %v2973_v34, %v2974_v60  ;;  %3049 = vmatpush.msra.mxu2 %v2974_v60 }
 0x5ef   :  { %v2976_v6 = vand.u32 4294901760, %v2975_v36  ;;  %v2629_v16 = vpop.f32.mrf.mxu3 }
 0x5f1   :  { %2977 = vmatpush.msrb.mxu3 %v2976_v6  ;;  %v2701_v5 = vpop.f32.mrf.mxu1 }
 0x5f2   :  { %2979 = vmatmul.f32.vlgmr.msrb.gmra.mxu3 %v4508_v35  ;;  %3051 = vmatmul.f32.vlgmr.msra.gmra.mxu2 %v4508_v35 }
 0x5f3   :  { %3071 = vmatpush.msra.mxu3 %v2946_v56  ;;  %3027 = vmatmul.f32.vlgmr.msra.gmra.mxu1 %v4516_v8  ;;  %v2563_v24 = vpop.f32.mrf.mxu2 }
 0x5f4   :  { %v2630_v20 = vadd.f32 %v2629_v16, %v2563_v24 }
 0x5f6   :  { %v2670_v1 = vadd.f32 %v2669_v10, %v2630_v20 }
 0x5f8   :  { %v2702_v15 = vadd.f32 %v2701_v5, %v2670_v1 }
 0x5fa   :  { %3073 = vmatmul.f32.vlgmr.msra.gmra.mxu3 %v4508_v35 }
 0x5fb   :  { %v2749_v29 = vpop.f32.mrf.mxu2 }
 0x5fc   :  { %v2750_v51 = vadd.f32 %v2749_v29, %v2702_v15 }
 0x601   :  { %v2779_v55 = vpop.f32.mrf.mxu3 }
 0x602   :  { %v5244_v41 = vadd.f32 %v2779_v55, %v2750_v51 }
 0x604   :  { %v2784_v37 = vmul.f32 %v5244_v41, %v5315_v48 }
 0x606   :  { %v3092_v31 = vand.u32 4294901760, %v2784_v37 }
 0x608   :  { %v3119_v18 = vsub.f32 %v2784_v37, %v3092_v31  ;;  %3093 = vmatpush.msrb.mxu0 %v3092_v31  ;;  %3169 = vmatpush.msrb.mxu3 %v3092_v31 }
 0x609   :  { %3099 = vmatmul.f32.vlgmr.msrb.gmra.mxu0 %v4529_v53  ;;  %3173 = vmatmul.f32.vlgmr.msrb.gmra.mxu3 %v4516_v8 }
 0x60a   :  { %3146 = vmatpush.msrb.mxu2 %v3119_v18  ;;  %v3120_v63 = vand.u32 4294901760, %v3119_v18 }
 0x60b   :  { %3149 = vmatmul.f32.vlgmr.msrb.gmra.mxu2 %v4511_v4 }
 0x60c   :  { %3195 = vmatpush.msra.mxu0 %v3120_v63  ;;  %v3121_v46 = vsub.f32 %v3119_v18, %v3120_v63 }
 0x60e   :  { %v3122_v2 = vand.u32 4294901760, %v3121_v46 }
 0x610   :  { %3123 = vmatpush.msrb.mxu1 %v3122_v2 }
 0x611   :  { %3125 = vmatmul.f32.vlgmr.msrb.gmra.mxu1 %v4508_v35  ;;  %3197 = vmatmul.f32.vlgmr.msra.gmra.mxu0 %v4508_v35 }
 0x612   :  { %3217 = vmatpush.msra.mxu1 %v3092_v31 }
 0x619   :  { %3219 = vmatmul.f32.vlgmr.msra.gmra.mxu1 %v4508_v35 }
 0x64e   :  { %v2808_v40 = vpop.f32.mrf.mxu0 }
 0x656   :  { %v2834_v13 = vpop.f32.mrf.mxu1  ;;  %v2858_v47 = vpop.f32.mrf.mxu0 }
 0x657   :  { %v2835_v14 = vadd.f32 %v2834_v13, %v2808_v40 }
 0x659   :  { %v2859_v42 = vadd.f32 %v2858_v47, %v2835_v14 }
 0x65e   :  { %v2882_v49 = vpop.f32.mrf.mxu1  ;;  %v2906_v32 = vpop.f32.mrf.mxu0 }
 0x65f   :  { %v2883_v12 = vadd.f32 %v2882_v49, %v2859_v42 }
 0x661   :  { %v2907_v43 = vadd.f32 %v2906_v32, %v2883_v12 }
 0x667   :  { %v2928_v23 = vpop.f32.mrf.mxu1 }
 0x668   :  { %v2929_v26 = vadd.f32 %v2928_v23, %v2907_v43 }
 0x669   :  { %v3004_v11 = vpop.f32.mrf.mxu0 }
 0x66d   :  { %v2954_v59 = vpop.f32.mrf.mxu2 }
 0x670   :  { %v3028_v57 = vpop.f32.mrf.mxu1 }
 0x675   :  { %v2980_v21 = vpop.f32.mrf.mxu3  ;;  %v3052_v25 = vpop.f32.mrf.mxu2 }
 0x676   :  { %v2981_v33 = vadd.f32 %v2980_v21, %v2954_v59 }
 0x678   :  { %v3005_v17 = vadd.f32 %v3004_v11, %v2981_v33 }
 0x67a   :  { %v3029_v7 = vadd.f32 %v3028_v57, %v3005_v17 }
 0x67c   :  { %v3053_v58 = vadd.f32 %v3052_v25, %v3029_v7 }
 0x67d   :  { %v3074_v54 = vpop.f32.mrf.mxu3 }
 0x67e   :  { %v3075_v61 = vadd.f32 %v3074_v54, %v3053_v58 }
 0x680   :  { %v3223_v34 = vadd.f32 %v3075_v61, %v2929_v26 }
 0x686   :  { %v3100_v28 = vpop.f32.mrf.mxu0 }
 0x68c   :  { %v3174_v19 = vpop.f32.mrf.mxu3 }
 0x68e   :  { %v3126_v50 = vpop.f32.mrf.mxu1  ;;  %v3150_v39 = vpop.f32.mrf.mxu2 }
 0x68f   :  { %v3127_v27 = vadd.f32 %v3126_v50, %v3100_v28  ;;  %v3198_v45 = vpop.f32.mrf.mxu0 }
 0x691   :  { %v3151_v3 = vadd.f32 %v3150_v39, %v3127_v27 }
 0x693   :  { %v3175_v22 = vadd.f32 %v3174_v19, %v3151_v3 }
 0x695   :  { %v3199_v38 = vadd.f32 %v3198_v45, %v3175_v22 }
 0x696   :  { %v3220_v56 = vpop.f32.mrf.mxu1 }
 0x697   :  { %v3221_v60 = vadd.f32 %v3220_v56, %v3199_v38 }
 0x699   :  { %v3224_v36 = vadd.f32 %v3223_v34, %v3221_v60 }
 0x69b   :  { %3225 = vadd.xlane.f32.xlu1 %v3224_v36 }
 0x70e   :  { %v3226_v6 = vpop.xlane.xlu1 %3225 }
 0x70f   :  { %v5254_v16 = vmul.f32 0.001953125, %v3226_v6  ;;  %v3885_v6 = vmov 2  }
 0x710   :  { %3762 = vset.pattern.permute.xlu2 %v3885_v6 }
 0x711   :  { %v3228_v24 = vmul.f32 %v5254_v16, %v4519_v62  ;;  %v3229_v10 = vmul.f32 %v5254_v16, %v4539_v9  ;;  %v3230_v20 = vmul.f32 %v5254_v16, %v5315_v48 }
 0x713   :  { %v3231_v1 = vsub.f32 %v5220_v30, %v3228_v24  ;;  %v3232_v5 = vsub.f32 %v5233_v44, %v3229_v10  ;;  %v3233_v15 = vsub.f32 %v2784_v37, %v3230_v20 }
 0x715   :  { %v3234_v29 = vmul.f32 %v3231_v1, %v3231_v1  ;;  %v3235_v51 = vmul.f32 %v3232_v5, %v3232_v5  ;;  %v3236_v55 = vmul.f32 %v3233_v15, %v3233_v15 }
 0x717   :  { %v3252_v31 = vand.u32 4294901760, %v3234_v29  ;;  %v3398_v18 = vand.u32 4294901760, %v3235_v51  ;;  %v3544_v46 = vand.u32 4294901760, %v3236_v55 }
 0x719   :  { %3253 = vmatpush.msra.mxu2 %v3252_v31  ;;  %3329 = vmatpush.msrb.mxu1 %v3252_v31  ;;  %v3279_v63 = vsub.f32 %v3234_v29, %v3252_v31  ;;  %v3425_v62 = vsub.f32 %v3235_v51, %v3398_v18  ;;  %v3571_v37 = vsub.f32 %v3236_v55, %v3544_v46 }
 0x71a   :  { %3259 = vmatmul.f32.vlgmr.msra.gmra.mxu2 %v4529_v53  ;;  %3333 = vmatmul.f32.vlgmr.msrb.gmra.mxu1 %v4516_v8 }
 0x71b   :  { %3306 = vmatpush.msrb.mxu0 %v3279_v63  ;;  %v3280_v9 = vand.u32 4294901760, %v3279_v63  ;;  %v3426_v30 = vand.u32 4294901760, %v3425_v62  ;;  %v3572_v13 = vand.u32 4294901760, %v3571_v37 }
 0x71c   :  { %3309 = vmatmul.f32.vlgmr.msrb.gmra.mxu0 %v4511_v4 }
 0x71d   :  { %3399 = vmatpush.msra.mxu0 %v3398_v18  ;;  %3355 = vmatpush.msrb.mxu2 %v3280_v9  ;;  %v3281_v44 = vsub.f32 %v3279_v63, %v3280_v9  ;;  %v3427_v48 = vsub.f32 %v3425_v62, %v3426_v30  ;;  %v3573_v47 = vsub.f32 %v3571_v37, %v3572_v13 }
 0x71f   :  { %3501 = vmatpush.msrb.mxu0 %v3426_v30  ;;  %3452 = vmatpush.msra.mxu2 %v3425_v62  ;;  %v3282_v2 = vand.u32 4294901760, %v3281_v44  ;;  %v3428_v40 = vand.u32 4294901760, %v3427_v48  ;;  %v3574_v49 = vand.u32 4294901760, %v3573_v47  ;;  %v3716_v47 = vld [vmem:[#allocation3 + $0x10] sm:$0xff] }
 0x721   :  { %3283 = vmatpush.msra.mxu3 %v3282_v2  ;;  %3429 = vmatpush.msra.mxu1 %v3428_v40  ;;  %v3714_v40 = vld [vmem:[#allocation3] sm:$0xff] }
 0x722   :  { %3285 = vmatmul.f32.vlgmr.msra.gmra.mxu3 %v4508_v35  ;;  %3357 = vmatmul.f32.vlgmr.msrb.gmra.mxu2 %v4508_v35 }
 0x723   :  { %3377 = vmatpush.msrb.mxu3 %v3252_v31  ;;  %3523 = vmatpush.msrb.mxu1 %v3398_v18 }
 0x724   :  { %3545 = vmatpush.msrb.mxu2 %v3544_v46  ;;  %3431 = vmatmul.f32.vlgmr.msra.gmra.mxu1 %v4508_v35 }
 0x725   :  { %3475 = vmatpush.msra.mxu3 %v3398_v18  ;;  %3621 = vmatpush.msra.mxu1 %v3544_v46  ;;  %v3769_v18 = vld [vmem:[#allocation8 + $0x18] sm:$0xff] }
 0x726   :  { %3405 = vmatmul.f32.vlgmr.msra.gmra.mxu0 %v4529_v53 }
 0x727   :  { %3598 = vmatpush.msra.mxu0 %v3571_v37 }
 0x72a   :  { %3379 = vmatmul.f32.vlgmr.msrb.gmra.mxu3 %v4508_v35  ;;  %3455 = vmatmul.f32.vlgmr.msra.gmra.mxu2 %v4511_v4 }
 0x72b   :  { %3575 = vmatpush.msrb.mxu3 %v3574_v49  ;;  %3647 = vmatpush.msra.mxu2 %v3572_v13  ;;  %v3715_v13 = vld [vmem:[#allocation3 + $0x8] sm:$0xff] }
 0x72c   :  { %3525 = vmatmul.f32.vlgmr.msrb.gmra.mxu1 %v4508_v35 }
 0x72e   :  { %3503 = vmatmul.f32.vlgmr.msrb.gmra.mxu0 %v4508_v35 }
 0x732   :  { %3479 = vmatmul.f32.vlgmr.msra.gmra.mxu3 %v4516_v8  ;;  %3551 = vmatmul.f32.vlgmr.msrb.gmra.mxu2 %v4529_v53 }
 0x733   :  { %3669 = vmatpush.msra.mxu3 %v3544_v46  ;;  %v3886_v46 = vmov 3  }
 0x734   :  { %3625 = vmatmul.f32.vlgmr.msra.gmra.mxu1 %v4516_v8  ;;  %3764 = vset.pattern.permute.xlu0 %v3886_v46 }
 0x736   :  { %3601 = vmatmul.f32.vlgmr.msra.gmra.mxu0 %v4511_v4 }
 0x73a   :  { %3577 = vmatmul.f32.vlgmr.msrb.gmra.mxu3 %v4508_v35  ;;  %3649 = vmatmul.f32.vlgmr.msra.gmra.mxu2 %v4508_v35 }
 0x742   :  { %3671 = vmatmul.f32.vlgmr.msra.gmra.mxu3 %v4508_v35 }
 0x797   :  { %v3334_v59 = vpop.f32.mrf.mxu1 }
 0x799   :  { %v3310_v23 = vpop.f32.mrf.mxu0 }
 0x79d   :  { %v3260_v32 = vpop.f32.mrf.mxu2 }
 0x7a1   :  { %v3432_v57 = vpop.f32.mrf.mxu1 }
 0x7a3   :  { %v3406_v33 = vpop.f32.mrf.mxu0 }
 0x7a4   :  { %v3433_v8 = vadd.f32 %v3432_v57, %v3406_v33 }
 0x7a5   :  { %v3286_v21 = vpop.f32.mrf.mxu3  ;;  %v3358_v11 = vpop.f32.mrf.mxu2 }
 0x7a6   :  { %v3287_v17 = vadd.f32 %v3286_v21, %v3260_v32 }
 0x7a8   :  { %v3311_v42 = vadd.f32 %v3310_v23, %v3287_v17 }
 0x7a9   :  { %v3526_v4 = vpop.f32.mrf.mxu1 }
 0x7aa   :  { %v3335_v50 = vadd.f32 %v3334_v59, %v3311_v42 }
 0x7ab   :  { %v3504_v25 = vpop.f32.mrf.mxu0 }
 0x7ac   :  { %v3359_v43 = vadd.f32 %v3358_v11, %v3335_v50 }
 0x7ad   :  { %v3380_v14 = vpop.f32.mrf.mxu3  ;;  %v3456_v53 = vpop.f32.mrf.mxu2 }
 0x7ae   :  { %v3457_v7 = vadd.f32 %v3456_v53, %v3433_v8  ;;  %v3381_v26 = vadd.f32 %v3380_v14, %v3359_v43 }
 0x7b1   :  { %v3626_v19 = vpop.f32.mrf.mxu1 }
 0x7b3   :  { %v3602_v39 = vpop.f32.mrf.mxu0 }
 0x7b5   :  { %v3480_v54 = vpop.f32.mrf.mxu3  ;;  %v3552_v28 = vpop.f32.mrf.mxu2 }
 0x7b6   :  { %v3481_v12 = vadd.f32 %v3480_v54, %v3457_v7 }
 0x7b8   :  { %v3505_v58 = vadd.f32 %v3504_v25, %v3481_v12 }
 0x7ba   :  { %v3527_v61 = vadd.f32 %v3526_v4, %v3505_v58 }
 0x7bc   :  { %v3675_v34 = vadd.f32 %v3527_v61, %v3381_v26 }
 0x7bd   :  { %v3578_v35 = vpop.f32.mrf.mxu3  ;;  %v3650_v45 = vpop.f32.mrf.mxu2 }
 0x7be   :  { %v3579_v27 = vadd.f32 %v3578_v35, %v3552_v28 }
 0x7c0   :  { %v3603_v3 = vadd.f32 %v3602_v39, %v3579_v27 }
 0x7c2   :  { %v3627_v22 = vadd.f32 %v3626_v19, %v3603_v3 }
 0x7c4   :  { %v3651_v38 = vadd.f32 %v3650_v45, %v3627_v22 }
 0x7c5   :  { %v3672_v56 = vpop.f32.mrf.mxu3 }
 0x7c6   :  { %v3673_v60 = vadd.f32 %v3672_v56, %v3651_v38 }
 0x7c8   :  { %v3676_v36 = vadd.f32 %v3675_v34, %v3673_v60 }
 0x7ca   :  { %3677 = vadd.xlane.f32.xlu0 %v3676_v36 }
 0x83d   :  { %v3678_v24 = vpop.xlane.xlu0 %3677 }
 0x83e   :  { %v3679_v10 = vmul.f32 0.001953125, %v3678_v24 }
 0x840   :  { %v3680_v20 = vadd.f32 1e-05, %v3679_v10 }
 0x842   :  { %3767 = vrsqrt.f32 %v3680_v20  ;;  %vm3687_vm14 = vweird.f32 %v3680_v20 }
 0x848   :  { %v3768_v1 = vpop.eup %3767 }
 0x849   :  { %v3682_v5 = vmul.f32 %v3768_v1, %v3680_v20  ;;  %vm3688_vm13 = vweird.f32 %v3768_v1 }
 0x84a   :  { %vm3689_vm15 = vmor %vm3687_vm14, %vm3688_vm13 }
 0x84b   :  { %v3683_v15 = vmul.f32 %v3768_v1, %v3682_v5 }
 0x84d   :  { %v3684_v29 = vmul.f32 0.5, %v3683_v15 }
 0x84f   :  { %v3685_v51 = vsub.f32 1.5, %v3684_v29 }
 0x851   :  { %v3686_v55 = vmul.f32 %v3768_v1, %v3685_v51 }
 0x853   :  { %v3690_v31 = vsel %vm3689_vm15, %v3768_v1, %v3686_v55 }
 0x854   :  { %v3691_v63 = vmul.f32 %v3769_v18, %v3690_v31 }
 0x856   :  { %v3700_v62 = vmul.f32 %v3691_v63, %v5254_v16 }
 0x858   :  { %3702 = vrot.lane.b32.xlu2 %v3700_v62, %s3878_s27 }
 0x860   :  { %3694 = vperm.xlu2 %3762, %v3691_v63  }
 0x868   :  { %3763 = vset.pattern.permute.xlu2 %v3886_v46 }
 0x8b2   :  { %v3703_v9 = vpop.permute.xlu2 %3702 }
 0x8b3   :  { %v3705_v30 = vsub.f32 %v3769_v18, %v3703_v9 }
 0x8b5   :  { %3708 = vperm.xlu2 %3763, %v3705_v30  }
 0x8ba   :  { %v3695_v44 = vpop.permute.xlu2 %3694 }
 0x8bb   :  { %v3697_v48 = vmul.f32 %v3695_v44, %v5216_v0  ;;  %v3698_v37 = vmul.f32 %v3695_v44, %v5229_v52  ;;  %v3699_v2 = vmul.f32 %v3695_v44, %v5244_v41 }
 0x90f   :  { %v3709_v16 = vpop.permute.xlu2 %3708 }
 0x910   :  { %v3711_v49 = vadd.f32 %v3709_v16, %v3697_v48  ;;  %v3712_v32 = vadd.f32 %v3709_v16, %v3698_v37  ;;  %v3713_v23 = vadd.f32 %v3709_v16, %v3699_v2 }
 0x912   :  { %v3717_v59 = vadd.f32 %v3714_v40, %v3711_v49  ;;  %v3718_v21 = vadd.f32 %v3715_v13, %v3712_v32  ;;  %v3719_v11 = vadd.f32 %v3716_v47, %v3713_v23 }
 0x914   :  { %v3720_v0 = vmax.f32 %v3717_v59, 0.0  ;;  %v3721_v52 = vmax.f32 %v3718_v21, 0.0  ;;  %v3722_v33 = vmax.f32 %v3719_v11, 0.0 }
 0x916   :  { %3723 = vst [vmem:[#allocation9] sm:$0xff] %v3720_v0 }
 0x917   :  { %3724 = vst [vmem:[#allocation9 + $0x8] sm:$0xff] %v3721_v52 }
 0x918   :  { %3725 = vst [vmem:[#allocation9 + $0x10] sm:$0xff] %v3722_v33 }
 0x919   :  { %3736 = dma.vmem_to_hbm [thread:$0]  %s3732_s6, 384, %s3734_s9, [#allocation5]  }
 0x91a   :  { %3870 = dma.done.wait [#allocation5], 384  }
 0x91b   :  { %3871 = vsyncadd [#allocation5], 4294966912 }
 0x91c   :  { %3741 = vsyncpa [#allocation4], 1 }
 0x91d   :  { %3742 = vsyncpa [#allocation7], 1 }
 0x91e   :  { %3743 = vsyncpa [#allocation5], 1 }

</bundles_post_ra>
